<compile_context>
chip_gen: v5e
topology: v5e:2x2
jax: 0.10.0
libtpu: 0.0.40
codegen_flags: <defaults>
</compile_context>

<pallas_src>
import jax
import jax.numpy as jnp
from jax import lax
from jax.experimental import pallas as pl
from jax.experimental.pallas import tpu as pltpu

# ---- scaled-down BERT config ----
VOCAB = 50
MAX_POS = 16
H = 32          # hidden
NH = 2          # heads
DH = H // NH    # head dim
FF = 64         # intermediate
LAYERS = 2
B = 2           # batch
S = 8           # max_seq_length
LN_EPS = 1e-12
NEG_INF = -1e9


# --------------------------- in-kernel helpers ------------------------------

def _layernorm(h, g, b):
    mean = jnp.mean(h, axis=-1, keepdims=True)
    c = h - mean
    var = jnp.mean(c * c, axis=-1, keepdims=True)
    return c * lax.rsqrt(var + LN_EPS) * g + b


def _erf(x):
    # Abramowitz & Stegun 7.1.26 polynomial (max abs error ~1.5e-7): matches
    # the exact erf-based gelu used by HF BertModel within f32 precision and
    # only uses ops guaranteed to lower in Mosaic (exp, mul, add, select).
    a1, a2, a3, a4, a5 = 0.254829592, -0.284496736, 1.421413741, -1.453152027, 1.061405429
    p = 0.3275911
    ax = jnp.abs(x)
    t = 1.0 / (1.0 + p * ax)
    poly = ((((a5 * t + a4) * t + a3) * t + a2) * t + a1) * t
    y = 1.0 - poly * jnp.exp(-ax * ax)
    return jnp.where(x >= 0.0, y, -y)


def _gelu(x):
    # exact (erf-based) BERT gelu
    return 0.5 * x * (1.0 + _erf(x * 0.7071067811865476))


# --------------------------- fused forward kernel ---------------------------

def _fused_bert_kernel(
    emb_ref, mask_ref,
    emb_ln_g_ref, emb_ln_b_ref,
    wqkv_ref, bqkv_ref, wo_ref, bo_ref, ln1_g_ref, ln1_b_ref,
    w1_ref, b1_ref, w2_ref, b2_ref, ln2_g_ref, ln2_b_ref,
    wp_ref, bp_ref, wfc_ref, bfc_ref,
    probs_ref,
):
    BS = B * S
    scale = 1.0 / (DH ** 0.5)

    # --- embedding LayerNorm (no zero residual) ---
    x = _layernorm(emb_ref[...], emb_ln_g_ref[...], emb_ln_b_ref[...])     # (BS, H)

    # --- additive attention-mask bias, one per batch row, hoisted once ---
    bias = ((1.0 - mask_ref[...]) * NEG_INF).reshape(B, 1, S)              # (B, 1, S)

    # --- encoder layers, statically unrolled ---
    for l in range(LAYERS):
        wo_l = wo_ref[l]                                                   # (H, H)

        # fused QKV projection: one (H, 3H) matmul, lane-dense output
        qkv = jnp.dot(x, wqkv_ref[l], preferred_element_type=jnp.float32) + bqkv_ref[l]
        qkv3 = qkv.reshape(B, S, 3 * H)                                    # (B, S, 3H)

        # multi-head attention; heads sliced along the lane axis in-kernel.
        # Per-head context is immediately projected through the matching rows
        # of W_o and accumulated -> no concat, epilogue stays lane-dense.
        acc = jnp.zeros((BS, H), jnp.float32)
        for h in range(NH):
            qh = qkv3[:, :, h * DH:(h + 1) * DH]                           # (B, S, DH)
            kh = qkv3[:, :, H + h * DH:H + (h + 1) * DH]
            vh = qkv3[:, :, 2 * H + h * DH:2 * H + (h + 1) * DH]
            s = jnp.einsum('bqd,bkd->bqk', qh, kh,
                           preferred_element_type=jnp.float32) * scale + bias
            m = jnp.max(s, axis=-1, keepdims=True)
            p = jnp.exp(s - m)
            p = p / jnp.sum(p, axis=-1, keepdims=True)
            ch = jnp.einsum('bqk,bkd->bqd', p, vh,
                            preferred_element_type=jnp.float32)            # (B, S, DH)
            acc = acc + jnp.dot(ch.reshape(BS, DH),
                                wo_l[h * DH:(h + 1) * DH, :],
                                preferred_element_type=jnp.float32)

        # fused output-projection bias + residual add + LayerNorm
        x = _layernorm(acc + bo_ref[l] + x, ln1_g_ref[l], ln1_b_ref[l])

        # feed-forward: gelu fused into w1 matmul, add+LN fused into w2 epilogue
        hh = _gelu(jnp.dot(x, w1_ref[l], preferred_element_type=jnp.float32) + b1_ref[l])
        ff = jnp.dot(hh, w2_ref[l], preferred_element_type=jnp.float32) + b2_ref[l]
        x = _layernorm(ff + x, ln2_g_ref[l], ln2_b_ref[l])

    # --- pooler (tanh on [CLS]) + dropout(p=0) + classifier + sigmoid ---
    cls = lax.slice_in_dim(x.reshape(B, S, H), 0, 1, axis=1).reshape(B, H)  # (B, H)
    pooled = jnp.tanh(jnp.dot(cls, wp_ref[...], preferred_element_type=jnp.float32)
                      + bp_ref[...])
    logit = jnp.dot(pooled, wfc_ref[...], preferred_element_type=jnp.float32) + bfc_ref[...]
    probs_ref[...] = (1.0 / (1.0 + jnp.exp(-logit))).astype(probs_ref.dtype)


# ----------------------------- parameters -----------------------------------

def init_params(key):
    keys = iter(jax.random.split(key, 64))

    def nrm(shape):
        return jax.random.normal(next(keys), shape, dtype=jnp.float32) * 0.02

    def zeros(shape):
        return jnp.zeros(shape, dtype=jnp.float32)

    def ones(shape):
        return jnp.ones(shape, dtype=jnp.float32)

    # Layer weights are stacked along a leading LAYERS axis; QKV is pre-packed
    # column-wise as [Wq | Wk | Wv] so the kernel does a single (H, 3H) matmul.
    return {
        "word_emb": nrm((VOCAB, H)),
        "pos_emb": nrm((MAX_POS, H)),
        "type_emb": nrm((2, H)),
        "emb_ln_g": ones((1, H)), "emb_ln_b": zeros((1, H)),
        "wqkv": nrm((LAYERS, H, 3 * H)), "bqkv": zeros((LAYERS, 1, 3 * H)),
        "wo": nrm((LAYERS, H, H)), "bo": zeros((LAYERS, 1, H)),
        "ln1_g": ones((LAYERS, 1, H)), "ln1_b": zeros((LAYERS, 1, H)),
        "w1": nrm((LAYERS, H, FF)), "b1": zeros((LAYERS, 1, FF)),
        "w2": nrm((LAYERS, FF, H)), "b2": zeros((LAYERS, 1, H)),
        "ln2_g": ones((LAYERS, 1, H)), "ln2_b": zeros((LAYERS, 1, H)),
        "wp": nrm((H, H)), "bp": zeros((1, H)),        # pooler
        "wfc": nrm((H, 1)), "bfc": zeros((1, 1)),      # nn.Linear(768->H, 1)
    }


_PARAM_ORDER = ("emb_ln_g", "emb_ln_b",
                "wqkv", "bqkv", "wo", "bo", "ln1_g", "ln1_b",
                "w1", "b1", "w2", "b2", "ln2_g", "ln2_b",
                "wp", "bp", "wfc", "bfc")


def _full_spec(shape):
    zeros = (0,) * len(shape)
    return pl.BlockSpec(shape, lambda i, _z=zeros: _z)


# ----------------------------- forward pass ---------------------------------

def bert_classifier_forward(params, input_ids, masks):
    """Returns (probs, None) exactly like BertCovidMisinfoClassifier.forward."""
    Bsz, Seq = input_ids.shape
    assert Bsz == B and Seq == S and Seq <= MAX_POS

    # TODO(synk): embedding-table gather stays as plain-JAX glue (token_type_ids == 0).
    emb = (params["word_emb"][input_ids]
           + params["pos_emb"][:Seq][None, :, :]
           + params["type_emb"][0][None, None, :]).reshape(Bsz * Seq, H)
    mask_f = masks.astype(jnp.float32)

    inputs = [emb, mask_f] + [params[k] for k in _PARAM_ORDER]

    probs = pl.pallas_call(
        _fused_bert_kernel,
        grid=(1,),
        in_specs=[_full_spec(a.shape) for a in inputs],
        out_specs=_full_spec((Bsz, 1)),
        out_shape=jax.ShapeDtypeStruct((Bsz, 1), jnp.float32),
        compiler_params=pltpu.CompilerParams(dimension_semantics=("arbitrary",)),
    )(*inputs)

    # dropout(drop_prob=0.0) is the identity; sigmoid applied in-kernel.
    return probs, None


# ----------------------------- main ------------------------------------------

if __name__ == "__main__":
    key = jax.random.PRNGKey(0)
    pkey, ikey = jax.random.split(key)
    params = init_params(pkey)

    input_ids = jax.random.randint(ikey, (B, S), 0, VOCAB, dtype=jnp.int32)
    masks = jnp.array([[1] * S, [1] * 6 + [0] * 2], dtype=jnp.int32)

    probs, aux = bert_classifier_forward(params, input_ids, masks)
    probs = jax.block_until_ready(probs)

    assert probs.shape == (B, 1), probs.shape
    assert aux is None
    assert bool(jnp.all(jnp.isfinite(probs)))
    assert bool(jnp.all((probs >= 0.0) & (probs <= 1.0)))
    print("KERNEL_OK")
</pallas_src>

<mosaic_0001>
module attributes {stable_mosaic.version = 11 : i64} {
  func.func @_fused_bert_kernel(%arg0: i32, %arg1: memref<16x32xf32, #tpu.memory_space<vmem>>, %arg2: memref<2x8xf32, #tpu.memory_space<vmem>>, %arg3: memref<1x32xf32, #tpu.memory_space<vmem>>, %arg4: memref<1x32xf32, #tpu.memory_space<vmem>>, %arg5: memref<2x32x96xf32, #tpu.memory_space<vmem>>, %arg6: memref<2x1x96xf32, #tpu.memory_space<vmem>>, %arg7: memref<2x32x32xf32, #tpu.memory_space<vmem>>, %arg8: memref<2x1x32xf32, #tpu.memory_space<vmem>>, %arg9: memref<2x1x32xf32, #tpu.memory_space<vmem>>, %arg10: memref<2x1x32xf32, #tpu.memory_space<vmem>>, %arg11: memref<2x32x64xf32, #tpu.memory_space<vmem>>, %arg12: memref<2x1x64xf32, #tpu.memory_space<vmem>>, %arg13: memref<2x64x32xf32, #tpu.memory_space<vmem>>, %arg14: memref<2x1x32xf32, #tpu.memory_space<vmem>>, %arg15: memref<2x1x32xf32, #tpu.memory_space<vmem>>, %arg16: memref<2x1x32xf32, #tpu.memory_space<vmem>>, %arg17: memref<32x32xf32, #tpu.memory_space<vmem>>, %arg18: memref<1x32xf32, #tpu.memory_space<vmem>>, %arg19: memref<32x1xf32, #tpu.memory_space<vmem>>, %arg20: memref<1x1xf32, #tpu.memory_space<vmem>>, %arg21: memref<2x1xf32, #tpu.memory_space<vmem>>) attributes {dimension_semantics = [#tpu.dimension_semantics<arbitrary>], iteration_bounds = array<i64: 1>, scalar_prefetch = 0 : i64, scratch_operands = 0 : i64, tpu.core_type = #tpu.core_type<tc>, window_params = [{pipeline_mode = #tpu.pipeline_mode<synchronous>, transform_indices = @transform_0, window_bounds = array<i64: 16, 32>}, {pipeline_mode = #tpu.pipeline_mode<synchronous>, transform_indices = @transform_1, window_bounds = array<i64: 2, 8>}, {pipeline_mode = #tpu.pipeline_mode<synchronous>, transform_indices = @transform_2, window_bounds = array<i64: 1, 32>}, {pipeline_mode = #tpu.pipeline_mode<synchronous>, transform_indices = @transform_3, window_bounds = array<i64: 1, 32>}, {pipeline_mode = #tpu.pipeline_mode<synchronous>, transform_indices = @transform_4, window_bounds = array<i64: 2, 32, 96>}, {pipeline_mode = #tpu.pipeline_mode<synchronous>, transform_indices = @transform_5, window_bounds = array<i64: 2, 1, 96>}, {pipeline_mode = #tpu.pipeline_mode<synchronous>, transform_indices = @transform_6, window_bounds = array<i64: 2, 32, 32>}, {pipeline_mode = #tpu.pipeline_mode<synchronous>, transform_indices = @transform_7, window_bounds = array<i64: 2, 1, 32>}, {pipeline_mode = #tpu.pipeline_mode<synchronous>, transform_indices = @transform_8, window_bounds = array<i64: 2, 1, 32>}, {pipeline_mode = #tpu.pipeline_mode<synchronous>, transform_indices = @transform_9, window_bounds = array<i64: 2, 1, 32>}, {pipeline_mode = #tpu.pipeline_mode<synchronous>, transform_indices = @transform_10, window_bounds = array<i64: 2, 32, 64>}, {pipeline_mode = #tpu.pipeline_mode<synchronous>, transform_indices = @transform_11, window_bounds = array<i64: 2, 1, 64>}, {pipeline_mode = #tpu.pipeline_mode<synchronous>, transform_indices = @transform_12, window_bounds = array<i64: 2, 64, 32>}, {pipeline_mode = #tpu.pipeline_mode<synchronous>, transform_indices = @transform_13, window_bounds = array<i64: 2, 1, 32>}, {pipeline_mode = #tpu.pipeline_mode<synchronous>, transform_indices = @transform_14, window_bounds = array<i64: 2, 1, 32>}, {pipeline_mode = #tpu.pipeline_mode<synchronous>, transform_indices = @transform_15, window_bounds = array<i64: 2, 1, 32>}, {pipeline_mode = #tpu.pipeline_mode<synchronous>, transform_indices = @transform_16, window_bounds = array<i64: 32, 32>}, {pipeline_mode = #tpu.pipeline_mode<synchronous>, transform_indices = @transform_17, window_bounds = array<i64: 1, 32>}, {pipeline_mode = #tpu.pipeline_mode<synchronous>, transform_indices = @transform_18, window_bounds = array<i64: 32, 1>}, {pipeline_mode = #tpu.pipeline_mode<synchronous>, transform_indices = @transform_19, window_bounds = array<i64: 1, 1>}, {pipeline_mode = #tpu.pipeline_mode<synchronous>, transform_indices = @transform_20, window_bounds = array<i64: 2, 1>}]} {
    %c0 = arith.constant 0 : index
    %c0_0 = arith.constant 0 : index
    %0 = vector.load %arg1[%c0, %c0_0] : memref<16x32xf32, #tpu.memory_space<vmem>>, vector<16x32xf32>
    %c0_1 = arith.constant 0 : index
    %c0_2 = arith.constant 0 : index
    %1 = vector.load %arg3[%c0_1, %c0_2] : memref<1x32xf32, #tpu.memory_space<vmem>>, vector<1x32xf32>
    %c0_3 = arith.constant 0 : index
    %c0_4 = arith.constant 0 : index
    %2 = vector.load %arg4[%c0_3, %c0_4] : memref<1x32xf32, #tpu.memory_space<vmem>>, vector<1x32xf32>
    %cst = arith.constant dense<0.000000e+00> : vector<16xf32>
    %3 = vector.multi_reduction <add>, %0, %cst [1] : vector<16x32xf32> to vector<16xf32>
    %4 = vector.shape_cast %3 : vector<16xf32> to vector<16x1xf32>
    %cst_5 = arith.constant 3.200000e+01 : f32
    %5 = vector.broadcast %cst_5 : f32 to vector<16x1xf32>
    %6 = arith.divf %4, %5 : vector<16x1xf32>
    %7 = vector.broadcast %6 : vector<16x1xf32> to vector<16x32xf32>
    %8 = arith.subf %0, %7 : vector<16x32xf32>
    %9 = arith.mulf %8, %8 : vector<16x32xf32>
    %cst_6 = arith.constant dense<0.000000e+00> : vector<16xf32>
    %10 = vector.multi_reduction <add>, %9, %cst_6 [1] : vector<16x32xf32> to vector<16xf32>
    %11 = vector.shape_cast %10 : vector<16xf32> to vector<16x1xf32>
    %cst_7 = arith.constant 3.200000e+01 : f32
    %12 = vector.broadcast %cst_7 : f32 to vector<16x1xf32>
    %13 = arith.divf %11, %12 : vector<16x1xf32>
    %cst_8 = arith.constant 9.99999996E-13 : f32
    %14 = vector.broadcast %cst_8 : f32 to vector<16x1xf32>
    %15 = arith.addf %13, %14 : vector<16x1xf32>
    %16 = math.rsqrt %15 : vector<16x1xf32>
    %17 = vector.broadcast %16 : vector<16x1xf32> to vector<16x32xf32>
    %18 = arith.mulf %8, %17 : vector<16x32xf32>
    %19 = vector.broadcast %1 : vector<1x32xf32> to vector<16x32xf32>
    %20 = arith.mulf %18, %19 : vector<16x32xf32>
    %21 = vector.broadcast %2 : vector<1x32xf32> to vector<16x32xf32>
    %22 = arith.addf %20, %21 : vector<16x32xf32>
    %c0_9 = arith.constant 0 : index
    %c0_10 = arith.constant 0 : index
    %23 = vector.load %arg2[%c0_9, %c0_10] : memref<2x8xf32, #tpu.memory_space<vmem>>, vector<2x8xf32>
    %cst_11 = arith.constant 1.000000e+00 : f32
    %24 = vector.broadcast %cst_11 : f32 to vector<2x8xf32>
    %25 = arith.subf %24, %23 : vector<2x8xf32>
    %cst_12 = arith.constant -1.000000e+09 : f32
    %26 = vector.broadcast %cst_12 : f32 to vector<2x8xf32>
    %27 = arith.mulf %25, %26 : vector<2x8xf32>
    %28 = vector.shape_cast %27 : vector<2x8xf32> to vector<2x1x8xf32>
    %c0_13 = arith.constant 0 : index
    %c0_14 = arith.constant 0 : index
    %c0_15 = arith.constant 0 : index
    %29 = vector.load %arg7[%c0_13, %c0_14, %c0_15] : memref<2x32x32xf32, #tpu.memory_space<vmem>>, vector<1x32x32xf32>
    %30 = vector.shape_cast %29 : vector<1x32x32xf32> to vector<32x32xf32>
    %c0_16 = arith.constant 0 : index
    %c0_17 = arith.constant 0 : index
    %c0_18 = arith.constant 0 : index
    %31 = vector.load %arg5[%c0_16, %c0_17, %c0_18] : memref<2x32x96xf32, #tpu.memory_space<vmem>>, vector<1x32x96xf32>
    %32 = vector.shape_cast %31 : vector<1x32x96xf32> to vector<32x96xf32>
    %cst_19 = arith.constant dense<0.000000e+00> : vector<16x96xf32>
    %33 = tpu.matmul %22, %32, %cst_19 {dimension_numbers = #tpu.dot_dimension_numbers<[1], [0], [0], [1], [0, 0, 1, 1], [], []>} : vector<16x32xf32>, vector<32x96xf32>, vector<16x96xf32> -> vector<16x96xf32>
    %c0_20 = arith.constant 0 : index
    %c0_21 = arith.constant 0 : index
    %c0_22 = arith.constant 0 : index
    %34 = vector.load %arg6[%c0_20, %c0_21, %c0_22] : memref<2x1x96xf32, #tpu.memory_space<vmem>>, vector<1x1x96xf32>
    %35 = vector.shape_cast %34 : vector<1x1x96xf32> to vector<1x96xf32>
    %36 = vector.broadcast %35 : vector<1x96xf32> to vector<16x96xf32>
    %37 = arith.addf %33, %36 : vector<16x96xf32>
    %38 = vector.shape_cast %37 : vector<16x96xf32> to vector<2x8x96xf32>
    %cst_23 = arith.constant 0.000000e+00 : f32
    %39 = vector.broadcast %cst_23 : f32 to vector<16x32xf32>
    %40 = vector.extract_strided_slice %38 {offsets = [0, 0, 0], sizes = [2, 8, 16], strides = [1, 1, 1]} : vector<2x8x96xf32> to vector<2x8x16xf32>
    %41 = vector.extract_strided_slice %38 {offsets = [0, 0, 32], sizes = [2, 8, 16], strides = [1, 1, 1]} : vector<2x8x96xf32> to vector<2x8x16xf32>
    %42 = vector.extract_strided_slice %38 {offsets = [0, 0, 64], sizes = [2, 8, 16], strides = [1, 1, 1]} : vector<2x8x96xf32> to vector<2x8x16xf32>
    "tpu.trace_start"() <{level = 10 : i32, message = "bqd,bkd->bqk"}> : () -> ()
    %cst_24 = arith.constant dense<0.000000e+00> : vector<2x8x8xf32>
    %43 = tpu.matmul %40, %41, %cst_24 {dimension_numbers = #tpu.dot_dimension_numbers<[2], [2], [1], [1], [0, 0, 0, 1, 1, 1], [0], [0]>} : vector<2x8x16xf32>, vector<2x8x16xf32>, vector<2x8x8xf32> -> vector<2x8x8xf32>
    "tpu.trace_stop"() : () -> ()
    %cst_25 = arith.constant 2.500000e-01 : f32
    %44 = vector.broadcast %cst_25 : f32 to vector<2x8x8xf32>
    %45 = arith.mulf %43, %44 : vector<2x8x8xf32>
    %46 = vector.broadcast %28 : vector<2x1x8xf32> to vector<2x8x8xf32>
    %47 = arith.addf %45, %46 : vector<2x8x8xf32>
    %cst_26 = arith.constant dense<0xFF800000> : vector<2x8xf32>
    %48 = vector.multi_reduction <maximumf>, %47, %cst_26 [2] : vector<2x8x8xf32> to vector<2x8xf32>
    %49 = vector.shape_cast %48 : vector<2x8xf32> to vector<2x8x1xf32>
    %50 = vector.broadcast %49 : vector<2x8x1xf32> to vector<2x8x8xf32>
    %51 = arith.subf %47, %50 : vector<2x8x8xf32>
    %52 = math.exp %51 : vector<2x8x8xf32>
    %cst_27 = arith.constant dense<0.000000e+00> : vector<2x8xf32>
    %53 = vector.multi_reduction <add>, %52, %cst_27 [2] : vector<2x8x8xf32> to vector<2x8xf32>
    %54 = vector.shape_cast %53 : vector<2x8xf32> to vector<2x8x1xf32>
    %55 = vector.broadcast %54 : vector<2x8x1xf32> to vector<2x8x8xf32>
    %56 = arith.divf %52, %55 : vector<2x8x8xf32>
    "tpu.trace_start"() <{level = 10 : i32, message = "bqk,bkd->bqd"}> : () -> ()
    %cst_28 = arith.constant dense<0.000000e+00> : vector<2x8x16xf32>
    %57 = tpu.matmul %56, %42, %cst_28 {dimension_numbers = #tpu.dot_dimension_numbers<[2], [1], [1], [2], [0, 0, 0, 1, 1, 2], [0], [0]>} : vector<2x8x8xf32>, vector<2x8x16xf32>, vector<2x8x16xf32> -> vector<2x8x16xf32>
    "tpu.trace_stop"() : () -> ()
    %58 = vector.shape_cast %57 : vector<2x8x16xf32> to vector<16x16xf32>
    %59 = vector.extract_strided_slice %30 {offsets = [0, 0], sizes = [16, 32], strides = [1, 1]} : vector<32x32xf32> to vector<16x32xf32>
    %cst_29 = arith.constant dense<0.000000e+00> : vector<16x32xf32>
    %60 = tpu.matmul %58, %59, %cst_29 {dimension_numbers = #tpu.dot_dimension_numbers<[1], [0], [0], [1], [0, 0, 1, 1], [], []>} : vector<16x16xf32>, vector<16x32xf32>, vector<16x32xf32> -> vector<16x32xf32>
    %61 = arith.addf %39, %60 : vector<16x32xf32>
    %62 = vector.extract_strided_slice %38 {offsets = [0, 0, 16], sizes = [2, 8, 16], strides = [1, 1, 1]} : vector<2x8x96xf32> to vector<2x8x16xf32>
    %63 = vector.extract_strided_slice %38 {offsets = [0, 0, 48], sizes = [2, 8, 16], strides = [1, 1, 1]} : vector<2x8x96xf32> to vector<2x8x16xf32>
    %64 = vector.extract_strided_slice %38 {offsets = [0, 0, 80], sizes = [2, 8, 16], strides = [1, 1, 1]} : vector<2x8x96xf32> to vector<2x8x16xf32>
    "tpu.trace_start"() <{level = 10 : i32, message = "bqd,bkd->bqk"}> : () -> ()
    %cst_30 = arith.constant dense<0.000000e+00> : vector<2x8x8xf32>
    %65 = tpu.matmul %62, %63, %cst_30 {dimension_numbers = #tpu.dot_dimension_numbers<[2], [2], [1], [1], [0, 0, 0, 1, 1, 1], [0], [0]>} : vector<2x8x16xf32>, vector<2x8x16xf32>, vector<2x8x8xf32> -> vector<2x8x8xf32>
    "tpu.trace_stop"() : () -> ()
    %cst_31 = arith.constant 2.500000e-01 : f32
    %66 = vector.broadcast %cst_31 : f32 to vector<2x8x8xf32>
    %67 = arith.mulf %65, %66 : vector<2x8x8xf32>
    %68 = vector.broadcast %28 : vector<2x1x8xf32> to vector<2x8x8xf32>
    %69 = arith.addf %67, %68 : vector<2x8x8xf32>
    %cst_32 = arith.constant dense<0xFF800000> : vector<2x8xf32>
    %70 = vector.multi_reduction <maximumf>, %69, %cst_32 [2] : vector<2x8x8xf32> to vector<2x8xf32>
    %71 = vector.shape_cast %70 : vector<2x8xf32> to vector<2x8x1xf32>
    %72 = vector.broadcast %71 : vector<2x8x1xf32> to vector<2x8x8xf32>
    %73 = arith.subf %69, %72 : vector<2x8x8xf32>
    %74 = math.exp %73 : vector<2x8x8xf32>
    %cst_33 = arith.constant dense<0.000000e+00> : vector<2x8xf32>
    %75 = vector.multi_reduction <add>, %74, %cst_33 [2] : vector<2x8x8xf32> to vector<2x8xf32>
    %76 = vector.shape_cast %75 : vector<2x8xf32> to vector<2x8x1xf32>
    %77 = vector.broadcast %76 : vector<2x8x1xf32> to vector<2x8x8xf32>
    %78 = arith.divf %74, %77 : vector<2x8x8xf32>
    "tpu.trace_start"() <{level = 10 : i32, message = "bqk,bkd->bqd"}> : () -> ()
    %cst_34 = arith.constant dense<0.000000e+00> : vector<2x8x16xf32>
    %79 = tpu.matmul %78, %64, %cst_34 {dimension_numbers = #tpu.dot_dimension_numbers<[2], [1], [1], [2], [0, 0, 0, 1, 1, 2], [0], [0]>} : vector<2x8x8xf32>, vector<2x8x16xf32>, vector<2x8x16xf32> -> vector<2x8x16xf32>
    "tpu.trace_stop"() : () -> ()
    %80 = vector.shape_cast %79 : vector<2x8x16xf32> to vector<16x16xf32>
    %81 = vector.extract_strided_slice %30 {offsets = [16, 0], sizes = [16, 32], strides = [1, 1]} : vector<32x32xf32> to vector<16x32xf32>
    %cst_35 = arith.constant dense<0.000000e+00> : vector<16x32xf32>
    %82 = tpu.matmul %80, %81, %cst_35 {dimension_numbers = #tpu.dot_dimension_numbers<[1], [0], [0], [1], [0, 0, 1, 1], [], []>} : vector<16x16xf32>, vector<16x32xf32>, vector<16x32xf32> -> vector<16x32xf32>
    %83 = arith.addf %61, %82 : vector<16x32xf32>
    %c0_36 = arith.constant 0 : index
    %c0_37 = arith.constant 0 : index
    %c0_38 = arith.constant 0 : index
    %84 = vector.load %arg8[%c0_36, %c0_37, %c0_38] : memref<2x1x32xf32, #tpu.memory_space<vmem>>, vector<1x1x32xf32>
    %85 = vector.shape_cast %84 : vector<1x1x32xf32> to vector<1x32xf32>
    %86 = vector.broadcast %85 : vector<1x32xf32> to vector<16x32xf32>
    %87 = arith.addf %83, %86 : vector<16x32xf32>
    %88 = arith.addf %87, %22 : vector<16x32xf32>
    %c0_39 = arith.constant 0 : index
    %c0_40 = arith.constant 0 : index
    %c0_41 = arith.constant 0 : index
    %89 = vector.load %arg9[%c0_39, %c0_40, %c0_41] : memref<2x1x32xf32, #tpu.memory_space<vmem>>, vector<1x1x32xf32>
    %90 = vector.shape_cast %89 : vector<1x1x32xf32> to vector<1x32xf32>
    %c0_42 = arith.constant 0 : index
    %c0_43 = arith.constant 0 : index
    %c0_44 = arith.constant 0 : index
    %91 = vector.load %arg10[%c0_42, %c0_43, %c0_44] : memref<2x1x32xf32, #tpu.memory_space<vmem>>, vector<1x1x32xf32>
    %92 = vector.shape_cast %91 : vector<1x1x32xf32> to vector<1x32xf32>
    %cst_45 = arith.constant dense<0.000000e+00> : vector<16xf32>
    %93 = vector.multi_reduction <add>, %88, %cst_45 [1] : vector<16x32xf32> to vector<16xf32>
    %94 = vector.shape_cast %93 : vector<16xf32> to vector<16x1xf32>
    %cst_46 = arith.constant 3.200000e+01 : f32
    %95 = vector.broadcast %cst_46 : f32 to vector<16x1xf32>
    %96 = arith.divf %94, %95 : vector<16x1xf32>
    %97 = vector.broadcast %96 : vector<16x1xf32> to vector<16x32xf32>
    %98 = arith.subf %88, %97 : vector<16x32xf32>
    %99 = arith.mulf %98, %98 : vector<16x32xf32>
    %cst_47 = arith.constant dense<0.000000e+00> : vector<16xf32>
    %100 = vector.multi_reduction <add>, %99, %cst_47 [1] : vector<16x32xf32> to vector<16xf32>
    %101 = vector.shape_cast %100 : vector<16xf32> to vector<16x1xf32>
    %cst_48 = arith.constant 3.200000e+01 : f32
    %102 = vector.broadcast %cst_48 : f32 to vector<16x1xf32>
    %103 = arith.divf %101, %102 : vector<16x1xf32>
    %cst_49 = arith.constant 9.99999996E-13 : f32
    %104 = vector.broadcast %cst_49 : f32 to vector<16x1xf32>
    %105 = arith.addf %103, %104 : vector<16x1xf32>
    %106 = math.rsqrt %105 : vector<16x1xf32>
    %107 = vector.broadcast %106 : vector<16x1xf32> to vector<16x32xf32>
    %108 = arith.mulf %98, %107 : vector<16x32xf32>
    %109 = vector.broadcast %90 : vector<1x32xf32> to vector<16x32xf32>
    %110 = arith.mulf %108, %109 : vector<16x32xf32>
    %111 = vector.broadcast %92 : vector<1x32xf32> to vector<16x32xf32>
    %112 = arith.addf %110, %111 : vector<16x32xf32>
    %c0_50 = arith.constant 0 : index
    %c0_51 = arith.constant 0 : index
    %c0_52 = arith.constant 0 : index
    %113 = vector.load %arg11[%c0_50, %c0_51, %c0_52] : memref<2x32x64xf32, #tpu.memory_space<vmem>>, vector<1x32x64xf32>
    %114 = vector.shape_cast %113 : vector<1x32x64xf32> to vector<32x64xf32>
    %cst_53 = arith.constant dense<0.000000e+00> : vector<16x64xf32>
    %115 = tpu.matmul %112, %114, %cst_53 {dimension_numbers = #tpu.dot_dimension_numbers<[1], [0], [0], [1], [0, 0, 1, 1], [], []>} : vector<16x32xf32>, vector<32x64xf32>, vector<16x64xf32> -> vector<16x64xf32>
    %c0_54 = arith.constant 0 : index
    %c0_55 = arith.constant 0 : index
    %c0_56 = arith.constant 0 : index
    %116 = vector.load %arg12[%c0_54, %c0_55, %c0_56] : memref<2x1x64xf32, #tpu.memory_space<vmem>>, vector<1x1x64xf32>
    %117 = vector.shape_cast %116 : vector<1x1x64xf32> to vector<1x64xf32>
    %118 = vector.broadcast %117 : vector<1x64xf32> to vector<16x64xf32>
    %119 = arith.addf %115, %118 : vector<16x64xf32>
    %cst_57 = arith.constant 5.000000e-01 : f32
    %120 = vector.broadcast %cst_57 : f32 to vector<16x64xf32>
    %121 = arith.mulf %120, %119 : vector<16x64xf32>
    %cst_58 = arith.constant 0.707106769 : f32
    %122 = vector.broadcast %cst_58 : f32 to vector<16x64xf32>
    %123 = arith.mulf %119, %122 : vector<16x64xf32>
    %124 = math.absf %123 : vector<16x64xf32>
    %cst_59 = arith.constant 0.327591091 : f32
    %125 = vector.broadcast %cst_59 : f32 to vector<16x64xf32>
    %126 = arith.mulf %125, %124 : vector<16x64xf32>
    %cst_60 = arith.constant 1.000000e+00 : f32
    %127 = vector.broadcast %cst_60 : f32 to vector<16x64xf32>
    %128 = arith.addf %127, %126 : vector<16x64xf32>
    %cst_61 = arith.constant 1.000000e+00 : f32
    %129 = vector.broadcast %cst_61 : f32 to vector<16x64xf32>
    %130 = arith.divf %129, %128 : vector<16x64xf32>
    %cst_62 = arith.constant 1.06140542 : f32
    %131 = vector.broadcast %cst_62 : f32 to vector<16x64xf32>
    %132 = arith.mulf %131, %130 : vector<16x64xf32>
    %cst_63 = arith.constant -1.45315206 : f32
    %133 = vector.broadcast %cst_63 : f32 to vector<16x64xf32>
    %134 = arith.addf %132, %133 : vector<16x64xf32>
    %135 = arith.mulf %134, %130 : vector<16x64xf32>
    %cst_64 = arith.constant 1.42141378 : f32
    %136 = vector.broadcast %cst_64 : f32 to vector<16x64xf32>
    %137 = arith.addf %135, %136 : vector<16x64xf32>
    %138 = arith.mulf %137, %130 : vector<16x64xf32>
    %cst_65 = arith.constant -0.284496725 : f32
    %139 = vector.broadcast %cst_65 : f32 to vector<16x64xf32>
    %140 = arith.addf %138, %139 : vector<16x64xf32>
    %141 = arith.mulf %140, %130 : vector<16x64xf32>
    %cst_66 = arith.constant 0.254829586 : f32
    %142 = vector.broadcast %cst_66 : f32 to vector<16x64xf32>
    %143 = arith.addf %141, %142 : vector<16x64xf32>
    %144 = arith.mulf %143, %130 : vector<16x64xf32>
    %cst_67 = arith.constant 0.000000e+00 : f32
    %145 = vector.broadcast %cst_67 : f32 to vector<16x64xf32>
    %146 = arith.subf %145, %124 : vector<16x64xf32>
    %147 = arith.mulf %146, %124 : vector<16x64xf32>
    %148 = math.exp %147 : vector<16x64xf32>
    %149 = arith.mulf %144, %148 : vector<16x64xf32>
    %cst_68 = arith.constant 1.000000e+00 : f32
    %150 = vector.broadcast %cst_68 : f32 to vector<16x64xf32>
    %151 = arith.subf %150, %149 : vector<16x64xf32>
    %cst_69 = arith.constant 0.000000e+00 : f32
    %152 = vector.broadcast %cst_69 : f32 to vector<16x64xf32>
    %153 = arith.cmpf oge, %123, %152 : vector<16x64xf32>
    %cst_70 = arith.constant 0.000000e+00 : f32
    %154 = vector.broadcast %cst_70 : f32 to vector<16x64xf32>
    %155 = arith.subf %154, %151 : vector<16x64xf32>
    %156 = arith.select %153, %151, %155 : vector<16x64xi1>, vector<16x64xf32>
    %cst_71 = arith.constant 1.000000e+00 : f32
    %157 = vector.broadcast %cst_71 : f32 to vector<16x64xf32>
    %158 = arith.addf %157, %156 : vector<16x64xf32>
    %159 = arith.mulf %121, %158 : vector<16x64xf32>
    %c0_72 = arith.constant 0 : index
    %c0_73 = arith.constant 0 : index
    %c0_74 = arith.constant 0 : index
    %160 = vector.load %arg13[%c0_72, %c0_73, %c0_74] : memref<2x64x32xf32, #tpu.memory_space<vmem>>, vector<1x64x32xf32>
    %161 = vector.shape_cast %160 : vector<1x64x32xf32> to vector<64x32xf32>
    %cst_75 = arith.constant dense<0.000000e+00> : vector<16x32xf32>
    %162 = tpu.matmul %159, %161, %cst_75 {dimension_numbers = #tpu.dot_dimension_numbers<[1], [0], [0], [1], [0, 0, 1, 1], [], []>} : vector<16x64xf32>, vector<64x32xf32>, vector<16x32xf32> -> vector<16x32xf32>
    %c0_76 = arith.constant 0 : index
    %c0_77 = arith.constant 0 : index
    %c0_78 = arith.constant 0 : index
    %163 = vector.load %arg14[%c0_76, %c0_77, %c0_78] : memref<2x1x32xf32, #tpu.memory_space<vmem>>, vector<1x1x32xf32>
    %164 = vector.shape_cast %163 : vector<1x1x32xf32> to vector<1x32xf32>
    %165 = vector.broadcast %164 : vector<1x32xf32> to vector<16x32xf32>
    %166 = arith.addf %162, %165 : vector<16x32xf32>
    %167 = arith.addf %166, %112 : vector<16x32xf32>
    %c0_79 = arith.constant 0 : index
    %c0_80 = arith.constant 0 : index
    %c0_81 = arith.constant 0 : index
    %168 = vector.load %arg15[%c0_79, %c0_80, %c0_81] : memref<2x1x32xf32, #tpu.memory_space<vmem>>, vector<1x1x32xf32>
    %169 = vector.shape_cast %168 : vector<1x1x32xf32> to vector<1x32xf32>
    %c0_82 = arith.constant 0 : index
    %c0_83 = arith.constant 0 : index
    %c0_84 = arith.constant 0 : index
    %170 = vector.load %arg16[%c0_82, %c0_83, %c0_84] : memref<2x1x32xf32, #tpu.memory_space<vmem>>, vector<1x1x32xf32>
    %171 = vector.shape_cast %170 : vector<1x1x32xf32> to vector<1x32xf32>
    %cst_85 = arith.constant dense<0.000000e+00> : vector<16xf32>
    %172 = vector.multi_reduction <add>, %167, %cst_85 [1] : vector<16x32xf32> to vector<16xf32>
    %173 = vector.shape_cast %172 : vector<16xf32> to vector<16x1xf32>
    %cst_86 = arith.constant 3.200000e+01 : f32
    %174 = vector.broadcast %cst_86 : f32 to vector<16x1xf32>
    %175 = arith.divf %173, %174 : vector<16x1xf32>
    %176 = vector.broadcast %175 : vector<16x1xf32> to vector<16x32xf32>
    %177 = arith.subf %167, %176 : vector<16x32xf32>
    %178 = arith.mulf %177, %177 : vector<16x32xf32>
    %cst_87 = arith.constant dense<0.000000e+00> : vector<16xf32>
    %179 = vector.multi_reduction <add>, %178, %cst_87 [1] : vector<16x32xf32> to vector<16xf32>
    %180 = vector.shape_cast %179 : vector<16xf32> to vector<16x1xf32>
    %cst_88 = arith.constant 3.200000e+01 : f32
    %181 = vector.broadcast %cst_88 : f32 to vector<16x1xf32>
    %182 = arith.divf %180, %181 : vector<16x1xf32>
    %cst_89 = arith.constant 9.99999996E-13 : f32
    %183 = vector.broadcast %cst_89 : f32 to vector<16x1xf32>
    %184 = arith.addf %182, %183 : vector<16x1xf32>
    %185 = math.rsqrt %184 : vector<16x1xf32>
    %186 = vector.broadcast %185 : vector<16x1xf32> to vector<16x32xf32>
    %187 = arith.mulf %177, %186 : vector<16x32xf32>
    %188 = vector.broadcast %169 : vector<1x32xf32> to vector<16x32xf32>
    %189 = arith.mulf %187, %188 : vector<16x32xf32>
    %190 = vector.broadcast %171 : vector<1x32xf32> to vector<16x32xf32>
    %191 = arith.addf %189, %190 : vector<16x32xf32>
    %c1 = arith.constant 1 : index
    %c0_90 = arith.constant 0 : index
    %c0_91 = arith.constant 0 : index
    %192 = vector.load %arg7[%c1, %c0_90, %c0_91] : memref<2x32x32xf32, #tpu.memory_space<vmem>>, vector<1x32x32xf32>
    %193 = vector.shape_cast %192 : vector<1x32x32xf32> to vector<32x32xf32>
    %c1_92 = arith.constant 1 : index
    %c0_93 = arith.constant 0 : index
    %c0_94 = arith.constant 0 : index
    %194 = vector.load %arg5[%c1_92, %c0_93, %c0_94] : memref<2x32x96xf32, #tpu.memory_space<vmem>>, vector<1x32x96xf32>
    %195 = vector.shape_cast %194 : vector<1x32x96xf32> to vector<32x96xf32>
    %cst_95 = arith.constant dense<0.000000e+00> : vector<16x96xf32>
    %196 = tpu.matmul %191, %195, %cst_95 {dimension_numbers = #tpu.dot_dimension_numbers<[1], [0], [0], [1], [0, 0, 1, 1], [], []>} : vector<16x32xf32>, vector<32x96xf32>, vector<16x96xf32> -> vector<16x96xf32>
    %c1_96 = arith.constant 1 : index
    %c0_97 = arith.constant 0 : index
    %c0_98 = arith.constant 0 : index
    %197 = vector.load %arg6[%c1_96, %c0_97, %c0_98] : memref<2x1x96xf32, #tpu.memory_space<vmem>>, vector<1x1x96xf32>
    %198 = vector.shape_cast %197 : vector<1x1x96xf32> to vector<1x96xf32>
    %199 = vector.broadcast %198 : vector<1x96xf32> to vector<16x96xf32>
    %200 = arith.addf %196, %199 : vector<16x96xf32>
    %201 = vector.shape_cast %200 : vector<16x96xf32> to vector<2x8x96xf32>
    %cst_99 = arith.constant 0.000000e+00 : f32
    %202 = vector.broadcast %cst_99 : f32 to vector<16x32xf32>
    %203 = vector.extract_strided_slice %201 {offsets = [0, 0, 0], sizes = [2, 8, 16], strides = [1, 1, 1]} : vector<2x8x96xf32> to vector<2x8x16xf32>
    %204 = vector.extract_strided_slice %201 {offsets = [0, 0, 32], sizes = [2, 8, 16], strides = [1, 1, 1]} : vector<2x8x96xf32> to vector<2x8x16xf32>
    %205 = vector.extract_strided_slice %201 {offsets = [0, 0, 64], sizes = [2, 8, 16], strides = [1, 1, 1]} : vector<2x8x96xf32> to vector<2x8x16xf32>
    "tpu.trace_start"() <{level = 10 : i32, message = "bqd,bkd->bqk"}> : () -> ()
    %cst_100 = arith.constant dense<0.000000e+00> : vector<2x8x8xf32>
    %206 = tpu.matmul %203, %204, %cst_100 {dimension_numbers = #tpu.dot_dimension_numbers<[2], [2], [1], [1], [0, 0, 0, 1, 1, 1], [0], [0]>} : vector<2x8x16xf32>, vector<2x8x16xf32>, vector<2x8x8xf32> -> vector<2x8x8xf32>
    "tpu.trace_stop"() : () -> ()
    %cst_101 = arith.constant 2.500000e-01 : f32
    %207 = vector.broadcast %cst_101 : f32 to vector<2x8x8xf32>
    %208 = arith.mulf %206, %207 : vector<2x8x8xf32>
    %209 = vector.broadcast %28 : vector<2x1x8xf32> to vector<2x8x8xf32>
    %210 = arith.addf %208, %209 : vector<2x8x8xf32>
    %cst_102 = arith.constant dense<0xFF800000> : vector<2x8xf32>
    %211 = vector.multi_reduction <maximumf>, %210, %cst_102 [2] : vector<2x8x8xf32> to vector<2x8xf32>
    %212 = vector.shape_cast %211 : vector<2x8xf32> to vector<2x8x1xf32>
    %213 = vector.broadcast %212 : vector<2x8x1xf32> to vector<2x8x8xf32>
    %214 = arith.subf %210, %213 : vector<2x8x8xf32>
    %215 = math.exp %214 : vector<2x8x8xf32>
    %cst_103 = arith.constant dense<0.000000e+00> : vector<2x8xf32>
    %216 = vector.multi_reduction <add>, %215, %cst_103 [2] : vector<2x8x8xf32> to vector<2x8xf32>
    %217 = vector.shape_cast %216 : vector<2x8xf32> to vector<2x8x1xf32>
    %218 = vector.broadcast %217 : vector<2x8x1xf32> to vector<2x8x8xf32>
    %219 = arith.divf %215, %218 : vector<2x8x8xf32>
    "tpu.trace_start"() <{level = 10 : i32, message = "bqk,bkd->bqd"}> : () -> ()
    %cst_104 = arith.constant dense<0.000000e+00> : vector<2x8x16xf32>
    %220 = tpu.matmul %219, %205, %cst_104 {dimension_numbers = #tpu.dot_dimension_numbers<[2], [1], [1], [2], [0, 0, 0, 1, 1, 2], [0], [0]>} : vector<2x8x8xf32>, vector<2x8x16xf32>, vector<2x8x16xf32> -> vector<2x8x16xf32>
    "tpu.trace_stop"() : () -> ()
    %221 = vector.shape_cast %220 : vector<2x8x16xf32> to vector<16x16xf32>
    %222 = vector.extract_strided_slice %193 {offsets = [0, 0], sizes = [16, 32], strides = [1, 1]} : vector<32x32xf32> to vector<16x32xf32>
    %cst_105 = arith.constant dense<0.000000e+00> : vector<16x32xf32>
    %223 = tpu.matmul %221, %222, %cst_105 {dimension_numbers = #tpu.dot_dimension_numbers<[1], [0], [0], [1], [0, 0, 1, 1], [], []>} : vector<16x16xf32>, vector<16x32xf32>, vector<16x32xf32> -> vector<16x32xf32>
    %224 = arith.addf %202, %223 : vector<16x32xf32>
    %225 = vector.extract_strided_slice %201 {offsets = [0, 0, 16], sizes = [2, 8, 16], strides = [1, 1, 1]} : vector<2x8x96xf32> to vector<2x8x16xf32>
    %226 = vector.extract_strided_slice %201 {offsets = [0, 0, 48], sizes = [2, 8, 16], strides = [1, 1, 1]} : vector<2x8x96xf32> to vector<2x8x16xf32>
    %227 = vector.extract_strided_slice %201 {offsets = [0, 0, 80], sizes = [2, 8, 16], strides = [1, 1, 1]} : vector<2x8x96xf32> to vector<2x8x16xf32>
    "tpu.trace_start"() <{level = 10 : i32, message = "bqd,bkd->bqk"}> : () -> ()
    %cst_106 = arith.constant dense<0.000000e+00> : vector<2x8x8xf32>
    %228 = tpu.matmul %225, %226, %cst_106 {dimension_numbers = #tpu.dot_dimension_numbers<[2], [2], [1], [1], [0, 0, 0, 1, 1, 1], [0], [0]>} : vector<2x8x16xf32>, vector<2x8x16xf32>, vector<2x8x8xf32> -> vector<2x8x8xf32>
    "tpu.trace_stop"() : () -> ()
    %cst_107 = arith.constant 2.500000e-01 : f32
    %229 = vector.broadcast %cst_107 : f32 to vector<2x8x8xf32>
    %230 = arith.mulf %228, %229 : vector<2x8x8xf32>
    %231 = vector.broadcast %28 : vector<2x1x8xf32> to vector<2x8x8xf32>
    %232 = arith.addf %230, %231 : vector<2x8x8xf32>
    %cst_108 = arith.constant dense<0xFF800000> : vector<2x8xf32>
    %233 = vector.multi_reduction <maximumf>, %232, %cst_108 [2] : vector<2x8x8xf32> to vector<2x8xf32>
    %234 = vector.shape_cast %233 : vector<2x8xf32> to vector<2x8x1xf32>
    %235 = vector.broadcast %234 : vector<2x8x1xf32> to vector<2x8x8xf32>
    %236 = arith.subf %232, %235 : vector<2x8x8xf32>
    %237 = math.exp %236 : vector<2x8x8xf32>
    %cst_109 = arith.constant dense<0.000000e+00> : vector<2x8xf32>
    %238 = vector.multi_reduction <add>, %237, %cst_109 [2] : vector<2x8x8xf32> to vector<2x8xf32>
    %239 = vector.shape_cast %238 : vector<2x8xf32> to vector<2x8x1xf32>
    %240 = vector.broadcast %239 : vector<2x8x1xf32> to vector<2x8x8xf32>
    %241 = arith.divf %237, %240 : vector<2x8x8xf32>
    "tpu.trace_start"() <{level = 10 : i32, message = "bqk,bkd->bqd"}> : () -> ()
    %cst_110 = arith.constant dense<0.000000e+00> : vector<2x8x16xf32>
    %242 = tpu.matmul %241, %227, %cst_110 {dimension_numbers = #tpu.dot_dimension_numbers<[2], [1], [1], [2], [0, 0, 0, 1, 1, 2], [0], [0]>} : vector<2x8x8xf32>, vector<2x8x16xf32>, vector<2x8x16xf32> -> vector<2x8x16xf32>
    "tpu.trace_stop"() : () -> ()
    %243 = vector.shape_cast %242 : vector<2x8x16xf32> to vector<16x16xf32>
    %244 = vector.extract_strided_slice %193 {offsets = [16, 0], sizes = [16, 32], strides = [1, 1]} : vector<32x32xf32> to vector<16x32xf32>
    %cst_111 = arith.constant dense<0.000000e+00> : vector<16x32xf32>
    %245 = tpu.matmul %243, %244, %cst_111 {dimension_numbers = #tpu.dot_dimension_numbers<[1], [0], [0], [1], [0, 0, 1, 1], [], []>} : vector<16x16xf32>, vector<16x32xf32>, vector<16x32xf32> -> vector<16x32xf32>
    %246 = arith.addf %224, %245 : vector<16x32xf32>
    %c1_112 = arith.constant 1 : index
    %c0_113 = arith.constant 0 : index
    %c0_114 = arith.constant 0 : index
    %247 = vector.load %arg8[%c1_112, %c0_113, %c0_114] : memref<2x1x32xf32, #tpu.memory_space<vmem>>, vector<1x1x32xf32>
    %248 = vector.shape_cast %247 : vector<1x1x32xf32> to vector<1x32xf32>
    %249 = vector.broadcast %248 : vector<1x32xf32> to vector<16x32xf32>
    %250 = arith.addf %246, %249 : vector<16x32xf32>
    %251 = arith.addf %250, %191 : vector<16x32xf32>
    %c1_115 = arith.constant 1 : index
    %c0_116 = arith.constant 0 : index
    %c0_117 = arith.constant 0 : index
    %252 = vector.load %arg9[%c1_115, %c0_116, %c0_117] : memref<2x1x32xf32, #tpu.memory_space<vmem>>, vector<1x1x32xf32>
    %253 = vector.shape_cast %252 : vector<1x1x32xf32> to vector<1x32xf32>
    %c1_118 = arith.constant 1 : index
    %c0_119 = arith.constant 0 : index
    %c0_120 = arith.constant 0 : index
    %254 = vector.load %arg10[%c1_118, %c0_119, %c0_120] : memref<2x1x32xf32, #tpu.memory_space<vmem>>, vector<1x1x32xf32>
    %255 = vector.shape_cast %254 : vector<1x1x32xf32> to vector<1x32xf32>
    %cst_121 = arith.constant dense<0.000000e+00> : vector<16xf32>
    %256 = vector.multi_reduction <add>, %251, %cst_121 [1] : vector<16x32xf32> to vector<16xf32>
    %257 = vector.shape_cast %256 : vector<16xf32> to vector<16x1xf32>
    %cst_122 = arith.constant 3.200000e+01 : f32
    %258 = vector.broadcast %cst_122 : f32 to vector<16x1xf32>
    %259 = arith.divf %257, %258 : vector<16x1xf32>
    %260 = vector.broadcast %259 : vector<16x1xf32> to vector<16x32xf32>
    %261 = arith.subf %251, %260 : vector<16x32xf32>
    %262 = arith.mulf %261, %261 : vector<16x32xf32>
    %cst_123 = arith.constant dense<0.000000e+00> : vector<16xf32>
    %263 = vector.multi_reduction <add>, %262, %cst_123 [1] : vector<16x32xf32> to vector<16xf32>
    %264 = vector.shape_cast %263 : vector<16xf32> to vector<16x1xf32>
    %cst_124 = arith.constant 3.200000e+01 : f32
    %265 = vector.broadcast %cst_124 : f32 to vector<16x1xf32>
    %266 = arith.divf %264, %265 : vector<16x1xf32>
    %cst_125 = arith.constant 9.99999996E-13 : f32
    %267 = vector.broadcast %cst_125 : f32 to vector<16x1xf32>
    %268 = arith.addf %266, %267 : vector<16x1xf32>
    %269 = math.rsqrt %268 : vector<16x1xf32>
    %270 = vector.broadcast %269 : vector<16x1xf32> to vector<16x32xf32>
    %271 = arith.mulf %261, %270 : vector<16x32xf32>
    %272 = vector.broadcast %253 : vector<1x32xf32> to vector<16x32xf32>
    %273 = arith.mulf %271, %272 : vector<16x32xf32>
    %274 = vector.broadcast %255 : vector<1x32xf32> to vector<16x32xf32>
    %275 = arith.addf %273, %274 : vector<16x32xf32>
    %c1_126 = arith.constant 1 : index
    %c0_127 = arith.constant 0 : index
    %c0_128 = arith.constant 0 : index
    %276 = vector.load %arg11[%c1_126, %c0_127, %c0_128] : memref<2x32x64xf32, #tpu.memory_space<vmem>>, vector<1x32x64xf32>
    %277 = vector.shape_cast %276 : vector<1x32x64xf32> to vector<32x64xf32>
    %cst_129 = arith.constant dense<0.000000e+00> : vector<16x64xf32>
    %278 = tpu.matmul %275, %277, %cst_129 {dimension_numbers = #tpu.dot_dimension_numbers<[1], [0], [0], [1], [0, 0, 1, 1], [], []>} : vector<16x32xf32>, vector<32x64xf32>, vector<16x64xf32> -> vector<16x64xf32>
    %c1_130 = arith.constant 1 : index
    %c0_131 = arith.constant 0 : index
    %c0_132 = arith.constant 0 : index
    %279 = vector.load %arg12[%c1_130, %c0_131, %c0_132] : memref<2x1x64xf32, #tpu.memory_space<vmem>>, vector<1x1x64xf32>
    %280 = vector.shape_cast %279 : vector<1x1x64xf32> to vector<1x64xf32>
    %281 = vector.broadcast %280 : vector<1x64xf32> to vector<16x64xf32>
    %282 = arith.addf %278, %281 : vector<16x64xf32>
    %cst_133 = arith.constant 5.000000e-01 : f32
    %283 = vector.broadcast %cst_133 : f32 to vector<16x64xf32>
    %284 = arith.mulf %283, %282 : vector<16x64xf32>
    %cst_134 = arith.constant 0.707106769 : f32
    %285 = vector.broadcast %cst_134 : f32 to vector<16x64xf32>
    %286 = arith.mulf %282, %285 : vector<16x64xf32>
    %287 = math.absf %286 : vector<16x64xf32>
    %cst_135 = arith.constant 0.327591091 : f32
    %288 = vector.broadcast %cst_135 : f32 to vector<16x64xf32>
    %289 = arith.mulf %288, %287 : vector<16x64xf32>
    %cst_136 = arith.constant 1.000000e+00 : f32
    %290 = vector.broadcast %cst_136 : f32 to vector<16x64xf32>
    %291 = arith.addf %290, %289 : vector<16x64xf32>
    %cst_137 = arith.constant 1.000000e+00 : f32
    %292 = vector.broadcast %cst_137 : f32 to vector<16x64xf32>
    %293 = arith.divf %292, %291 : vector<16x64xf32>
    %cst_138 = arith.constant 1.06140542 : f32
    %294 = vector.broadcast %cst_138 : f32 to vector<16x64xf32>
    %295 = arith.mulf %294, %293 : vector<16x64xf32>
    %cst_139 = arith.constant -1.45315206 : f32
    %296 = vector.broadcast %cst_139 : f32 to vector<16x64xf32>
    %297 = arith.addf %295, %296 : vector<16x64xf32>
    %298 = arith.mulf %297, %293 : vector<16x64xf32>
    %cst_140 = arith.constant 1.42141378 : f32
    %299 = vector.broadcast %cst_140 : f32 to vector<16x64xf32>
    %300 = arith.addf %298, %299 : vector<16x64xf32>
    %301 = arith.mulf %300, %293 : vector<16x64xf32>
    %cst_141 = arith.constant -0.284496725 : f32
    %302 = vector.broadcast %cst_141 : f32 to vector<16x64xf32>
    %303 = arith.addf %301, %302 : vector<16x64xf32>
    %304 = arith.mulf %303, %293 : vector<16x64xf32>
    %cst_142 = arith.constant 0.254829586 : f32
    %305 = vector.broadcast %cst_142 : f32 to vector<16x64xf32>
    %306 = arith.addf %304, %305 : vector<16x64xf32>
    %307 = arith.mulf %306, %293 : vector<16x64xf32>
    %cst_143 = arith.constant 0.000000e+00 : f32
    %308 = vector.broadcast %cst_143 : f32 to vector<16x64xf32>
    %309 = arith.subf %308, %287 : vector<16x64xf32>
    %310 = arith.mulf %309, %287 : vector<16x64xf32>
    %311 = math.exp %310 : vector<16x64xf32>
    %312 = arith.mulf %307, %311 : vector<16x64xf32>
    %cst_144 = arith.constant 1.000000e+00 : f32
    %313 = vector.broadcast %cst_144 : f32 to vector<16x64xf32>
    %314 = arith.subf %313, %312 : vector<16x64xf32>
    %cst_145 = arith.constant 0.000000e+00 : f32
    %315 = vector.broadcast %cst_145 : f32 to vector<16x64xf32>
    %316 = arith.cmpf oge, %286, %315 : vector<16x64xf32>
    %cst_146 = arith.constant 0.000000e+00 : f32
    %317 = vector.broadcast %cst_146 : f32 to vector<16x64xf32>
    %318 = arith.subf %317, %314 : vector<16x64xf32>
    %319 = arith.select %316, %314, %318 : vector<16x64xi1>, vector<16x64xf32>
    %cst_147 = arith.constant 1.000000e+00 : f32
    %320 = vector.broadcast %cst_147 : f32 to vector<16x64xf32>
    %321 = arith.addf %320, %319 : vector<16x64xf32>
    %322 = arith.mulf %284, %321 : vector<16x64xf32>
    %c1_148 = arith.constant 1 : index
    %c0_149 = arith.constant 0 : index
    %c0_150 = arith.constant 0 : index
    %323 = vector.load %arg13[%c1_148, %c0_149, %c0_150] : memref<2x64x32xf32, #tpu.memory_space<vmem>>, vector<1x64x32xf32>
    %324 = vector.shape_cast %323 : vector<1x64x32xf32> to vector<64x32xf32>
    %cst_151 = arith.constant dense<0.000000e+00> : vector<16x32xf32>
    %325 = tpu.matmul %322, %324, %cst_151 {dimension_numbers = #tpu.dot_dimension_numbers<[1], [0], [0], [1], [0, 0, 1, 1], [], []>} : vector<16x64xf32>, vector<64x32xf32>, vector<16x32xf32> -> vector<16x32xf32>
    %c1_152 = arith.constant 1 : index
    %c0_153 = arith.constant 0 : index
    %c0_154 = arith.constant 0 : index
    %326 = vector.load %arg14[%c1_152, %c0_153, %c0_154] : memref<2x1x32xf32, #tpu.memory_space<vmem>>, vector<1x1x32xf32>
    %327 = vector.shape_cast %326 : vector<1x1x32xf32> to vector<1x32xf32>
    %328 = vector.broadcast %327 : vector<1x32xf32> to vector<16x32xf32>
    %329 = arith.addf %325, %328 : vector<16x32xf32>
    %330 = arith.addf %329, %275 : vector<16x32xf32>
    %c1_155 = arith.constant 1 : index
    %c0_156 = arith.constant 0 : index
    %c0_157 = arith.constant 0 : index
    %331 = vector.load %arg15[%c1_155, %c0_156, %c0_157] : memref<2x1x32xf32, #tpu.memory_space<vmem>>, vector<1x1x32xf32>
    %332 = vector.shape_cast %331 : vector<1x1x32xf32> to vector<1x32xf32>
    %c1_158 = arith.constant 1 : index
    %c0_159 = arith.constant 0 : index
    %c0_160 = arith.constant 0 : index
    %333 = vector.load %arg16[%c1_158, %c0_159, %c0_160] : memref<2x1x32xf32, #tpu.memory_space<vmem>>, vector<1x1x32xf32>
    %334 = vector.shape_cast %333 : vector<1x1x32xf32> to vector<1x32xf32>
    %cst_161 = arith.constant dense<0.000000e+00> : vector<16xf32>
    %335 = vector.multi_reduction <add>, %330, %cst_161 [1] : vector<16x32xf32> to vector<16xf32>
    %336 = vector.shape_cast %335 : vector<16xf32> to vector<16x1xf32>
    %cst_162 = arith.constant 3.200000e+01 : f32
    %337 = vector.broadcast %cst_162 : f32 to vector<16x1xf32>
    %338 = arith.divf %336, %337 : vector<16x1xf32>
    %339 = vector.broadcast %338 : vector<16x1xf32> to vector<16x32xf32>
    %340 = arith.subf %330, %339 : vector<16x32xf32>
    %341 = arith.mulf %340, %340 : vector<16x32xf32>
    %cst_163 = arith.constant dense<0.000000e+00> : vector<16xf32>
    %342 = vector.multi_reduction <add>, %341, %cst_163 [1] : vector<16x32xf32> to vector<16xf32>
    %343 = vector.shape_cast %342 : vector<16xf32> to vector<16x1xf32>
    %cst_164 = arith.constant 3.200000e+01 : f32
    %344 = vector.broadcast %cst_164 : f32 to vector<16x1xf32>
    %345 = arith.divf %343, %344 : vector<16x1xf32>
    %cst_165 = arith.constant 9.99999996E-13 : f32
    %346 = vector.broadcast %cst_165 : f32 to vector<16x1xf32>
    %347 = arith.addf %345, %346 : vector<16x1xf32>
    %348 = math.rsqrt %347 : vector<16x1xf32>
    %349 = vector.broadcast %348 : vector<16x1xf32> to vector<16x32xf32>
    %350 = arith.mulf %340, %349 : vector<16x32xf32>
    %351 = vector.broadcast %332 : vector<1x32xf32> to vector<16x32xf32>
    %352 = arith.mulf %350, %351 : vector<16x32xf32>
    %353 = vector.broadcast %334 : vector<1x32xf32> to vector<16x32xf32>
    %354 = arith.addf %352, %353 : vector<16x32xf32>
    %355 = vector.shape_cast %354 : vector<16x32xf32> to vector<2x8x32xf32>
    %356 = vector.extract_strided_slice %355 {offsets = [0, 0, 0], sizes = [2, 1, 32], strides = [1, 1, 1]} : vector<2x8x32xf32> to vector<2x1x32xf32>
    %357 = vector.shape_cast %356 : vector<2x1x32xf32> to vector<2x32xf32>
    %c0_166 = arith.constant 0 : index
    %c0_167 = arith.constant 0 : index
    %358 = vector.load %arg17[%c0_166, %c0_167] : memref<32x32xf32, #tpu.memory_space<vmem>>, vector<32x32xf32>
    %cst_168 = arith.constant dense<0.000000e+00> : vector<2x32xf32>
    %359 = tpu.matmul %357, %358, %cst_168 {dimension_numbers = #tpu.dot_dimension_numbers<[1], [0], [0], [1], [0, 0, 1, 1], [], []>} : vector<2x32xf32>, vector<32x32xf32>, vector<2x32xf32> -> vector<2x32xf32>
    %c0_169 = arith.constant 0 : index
    %c0_170 = arith.constant 0 : index
    %360 = vector.load %arg18[%c0_169, %c0_170] : memref<1x32xf32, #tpu.memory_space<vmem>>, vector<1x32xf32>
    %361 = vector.broadcast %360 : vector<1x32xf32> to vector<2x32xf32>
    %362 = arith.addf %359, %361 : vector<2x32xf32>
    %363 = math.tanh %362 : vector<2x32xf32>
    %c0_171 = arith.constant 0 : index
    %c0_172 = arith.constant 0 : index
    %364 = vector.load %arg19[%c0_171, %c0_172] : memref<32x1xf32, #tpu.memory_space<vmem>>, vector<32x1xf32>
    %cst_173 = arith.constant dense<0.000000e+00> : vector<2x1xf32>
    %365 = tpu.matmul %363, %364, %cst_173 {dimension_numbers = #tpu.dot_dimension_numbers<[1], [0], [0], [1], [0, 0, 1, 1], [], []>} : vector<2x32xf32>, vector<32x1xf32>, vector<2x1xf32> -> vector<2x1xf32>
    %c0_174 = arith.constant 0 : index
    %c0_175 = arith.constant 0 : index
    %366 = vector.load %arg20[%c0_174, %c0_175] : memref<1x1xf32, #tpu.memory_space<vmem>>, vector<1x1xf32>
    %367 = vector.broadcast %366 : vector<1x1xf32> to vector<2x1xf32>
    %368 = arith.addf %365, %367 : vector<2x1xf32>
    %cst_176 = arith.constant 0.000000e+00 : f32
    %369 = vector.broadcast %cst_176 : f32 to vector<2x1xf32>
    %370 = arith.subf %369, %368 : vector<2x1xf32>
    %371 = math.exp %370 : vector<2x1xf32>
    %cst_177 = arith.constant 1.000000e+00 : f32
    %372 = vector.broadcast %cst_177 : f32 to vector<2x1xf32>
    %373 = arith.addf %372, %371 : vector<2x1xf32>
    %cst_178 = arith.constant 1.000000e+00 : f32
    %374 = vector.broadcast %cst_178 : f32 to vector<2x1xf32>
    %375 = arith.divf %374, %373 : vector<2x1xf32>
    %c0_179 = arith.constant 0 : index
    %c0_180 = arith.constant 0 : index
    %376 = vector.load %arg21[%c0_179, %c0_180] : memref<2x1xf32, #tpu.memory_space<vmem>>, vector<2x1xf32>
    tpu.vector_store %arg21[%c0_179, %c0_180], %375 {strides = array<i32>} : memref<2x1xf32, #tpu.memory_space<vmem>>, vector<2x1xf32>,
    return
  }
  func.func @transform_0(%arg0: i32) -> (i32, i32) {
    %c0_i32 = arith.constant 0 : i32
    %c0_i32_0 = arith.constant 0 : i32
    %c0_i32_1 = arith.constant 0 : i32
    return %c0_i32, %c0_i32_0 : i32, i32
  }
  func.func @transform_1(%arg0: i32) -> (i32, i32) {
    %c0_i32 = arith.constant 0 : i32
    %c0_i32_0 = arith.constant 0 : i32
    %c0_i32_1 = arith.constant 0 : i32
    return %c0_i32, %c0_i32_0 : i32, i32
  }
  func.func @transform_2(%arg0: i32) -> (i32, i32) {
    %c0_i32 = arith.constant 0 : i32
    %c0_i32_0 = arith.constant 0 : i32
    %c0_i32_1 = arith.constant 0 : i32
    return %c0_i32, %c0_i32_0 : i32, i32
  }
  func.func @transform_3(%arg0: i32) -> (i32, i32) {
    %c0_i32 = arith.constant 0 : i32
    %c0_i32_0 = arith.constant 0 : i32
    %c0_i32_1 = arith.constant 0 : i32
    return %c0_i32, %c0_i32_0 : i32, i32
  }
  func.func @transform_4(%arg0: i32) -> (i32, i32, i32) {
    %c0_i32 = arith.constant 0 : i32
    %c0_i32_0 = arith.constant 0 : i32
    %c0_i32_1 = arith.constant 0 : i32
    %c0_i32_2 = arith.constant 0 : i32
    return %c0_i32, %c0_i32_0, %c0_i32_1 : i32, i32, i32
  }
  func.func @transform_5(%arg0: i32) -> (i32, i32, i32) {
    %c0_i32 = arith.constant 0 : i32
    %c0_i32_0 = arith.constant 0 : i32
    %c0_i32_1 = arith.constant 0 : i32
    %c0_i32_2 = arith.constant 0 : i32
    return %c0_i32, %c0_i32_0, %c0_i32_1 : i32, i32, i32
  }
  func.func @transform_6(%arg0: i32) -> (i32, i32, i32) {
    %c0_i32 = arith.constant 0 : i32
    %c0_i32_0 = arith.constant 0 : i32
    %c0_i32_1 = arith.constant 0 : i32
    %c0_i32_2 = arith.constant 0 : i32
    return %c0_i32, %c0_i32_0, %c0_i32_1 : i32, i32, i32
  }
  func.func @transform_7(%arg0: i32) -> (i32, i32, i32) {
    %c0_i32 = arith.constant 0 : i32
    %c0_i32_0 = arith.constant 0 : i32
    %c0_i32_1 = arith.constant 0 : i32
    %c0_i32_2 = arith.constant 0 : i32
    return %c0_i32, %c0_i32_0, %c0_i32_1 : i32, i32, i32
  }
  func.func @transform_8(%arg0: i32) -> (i32, i32, i32) {
    %c0_i32 = arith.constant 0 : i32
    %c0_i32_0 = arith.constant 0 : i32
    %c0_i32_1 = arith.constant 0 : i32
    %c0_i32_2 = arith.constant 0 : i32
    return %c0_i32, %c0_i32_0, %c0_i32_1 : i32, i32, i32
  }
  func.func @transform_9(%arg0: i32) -> (i32, i32, i32) {
    %c0_i32 = arith.constant 0 : i32
    %c0_i32_0 = arith.constant 0 : i32
    %c0_i32_1 = arith.constant 0 : i32
    %c0_i32_2 = arith.constant 0 : i32
    return %c0_i32, %c0_i32_0, %c0_i32_1 : i32, i32, i32
  }
  func.func @transform_10(%arg0: i32) -> (i32, i32, i32) {
    %c0_i32 = arith.constant 0 : i32
    %c0_i32_0 = arith.constant 0 : i32
    %c0_i32_1 = arith.constant 0 : i32
    %c0_i32_2 = arith.constant 0 : i32
    return %c0_i32, %c0_i32_0, %c0_i32_1 : i32, i32, i32
  }
  func.func @transform_11(%arg0: i32) -> (i32, i32, i32) {
    %c0_i32 = arith.constant 0 : i32
    %c0_i32_0 = arith.constant 0 : i32
    %c0_i32_1 = arith.constant 0 : i32
    %c0_i32_2 = arith.constant 0 : i32
    return %c0_i32, %c0_i32_0, %c0_i32_1 : i32, i32, i32
  }
  func.func @transform_12(%arg0: i32) -> (i32, i32, i32) {
    %c0_i32 = arith.constant 0 : i32
    %c0_i32_0 = arith.constant 0 : i32
    %c0_i32_1 = arith.constant 0 : i32
    %c0_i32_2 = arith.constant 0 : i32
    return %c0_i32, %c0_i32_0, %c0_i32_1 : i32, i32, i32
  }
  func.func @transform_13(%arg0: i32) -> (i32, i32, i32) {
    %c0_i32 = arith.constant 0 : i32
    %c0_i32_0 = arith.constant 0 : i32
    %c0_i32_1 = arith.constant 0 : i32
    %c0_i32_2 = arith.constant 0 : i32
    return %c0_i32, %c0_i32_0, %c0_i32_1 : i32, i32, i32
  }
  func.func @transform_14(%arg0: i32) -> (i32, i32, i32) {
    %c0_i32 = arith.constant 0 : i32
    %c0_i32_0 = arith.constant 0 : i32
    %c0_i32_1 = arith.constant 0 : i32
    %c0_i32_2 = arith.constant 0 : i32
    return %c0_i32, %c0_i32_0, %c0_i32_1 : i32, i32, i32
  }
  func.func @transform_15(%arg0: i32) -> (i32, i32, i32) {
    %c0_i32 = arith.constant 0 : i32
    %c0_i32_0 = arith.constant 0 : i32
    %c0_i32_1 = arith.constant 0 : i32
    %c0_i32_2 = arith.constant 0 : i32
    return %c0_i32, %c0_i32_0, %c0_i32_1 : i32, i32, i32
  }
  func.func @transform_16(%arg0: i32) -> (i32, i32) {
    %c0_i32 = arith.constant 0 : i32
    %c0_i32_0 = arith.constant 0 : i32
    %c0_i32_1 = arith.constant 0 : i32
    return %c0_i32, %c0_i32_0 : i32, i32
  }
  func.func @transform_17(%arg0: i32) -> (i32, i32) {
    %c0_i32 = arith.constant 0 : i32
    %c0_i32_0 = arith.constant 0 : i32
    %c0_i32_1 = arith.constant 0 : i32
    return %c0_i32, %c0_i32_0 : i32, i32
  }
  func.func @transform_18(%arg0: i32) -> (i32, i32) {
    %c0_i32 = arith.constant 0 : i32
    %c0_i32_0 = arith.constant 0 : i32
    %c0_i32_1 = arith.constant 0 : i32
    return %c0_i32, %c0_i32_0 : i32, i32
  }
  func.func @transform_19(%arg0: i32) -> (i32, i32) {
    %c0_i32 = arith.constant 0 : i32
    %c0_i32_0 = arith.constant 0 : i32
    %c0_i32_1 = arith.constant 0 : i32
    return %c0_i32, %c0_i32_0 : i32, i32
  }
  func.func @transform_20(%arg0: i32) -> (i32, i32) {
    %c0_i32 = arith.constant 0 : i32
    %c0_i32_0 = arith.constant 0 : i32
    %c0_i32_1 = arith.constant 0 : i32
    return %c0_i32, %c0_i32_0 : i32, i32
  }
}

</mosaic_0001>

<bundles_post_ra>
// kernel: tpu_custom_call.1
= control target key start
LH: loop header
LB: loop body
LE: loop exit
PB: predicated region body
PF: predicated region fallthrough
CT: control target
= control target key end

     0   :  { %s2626_s0 = inlined_call_operand.hbm [shape: f32[16,32], index: 0, kind: input, shape index: {}]   ;;  %s2627_s1 = inlined_call_operand.hbm [shape: f32[2,8], index: 1, kind: input, shape index: {}]   ;;  %s2628_s2 = inlined_call_operand.vmem [shape: f32[1,32], index: 2, kind: input, shape index: {}]   ;;  %s2629_s3 = inlined_call_operand.hbm [shape: f32[1,32], index: 3, kind: input, shape index: {}]   ;;  %s2630_s4 = inlined_call_operand.vmem [shape: f32[2,32,96], index: 4, kind: input, shape index: {}]   ;;  %s2631_s5 = inlined_call_operand.vmem [shape: f32[2,1,96], index: 5, kind: input, shape index: {}]   ;;  %s2632_s6 = inlined_call_operand.vmem [shape: f32[2,32,32], index: 6, kind: input, shape index: {}]   ;;  %s2633_s7 = inlined_call_operand.vmem [shape: f32[2,1,32], index: 7, kind: input, shape index: {}]   ;;  %s2634_s8 = inlined_call_operand.vmem [shape: f32[2,1,32], index: 8, kind: input, shape index: {}]   ;;  %s2635_s9 = inlined_call_operand.hbm [shape: f32[2,1,32], index: 9, kind: input, shape index: {}]   ;;  %s2636_s10 = inlined_call_operand.vmem [shape: f32[2,32,64], index: 10, kind: input, shape index: {}]   ;;  %s2637_s11 = inlined_call_operand.vmem [shape: f32[2,1,64], index: 11, kind: input, shape index: {}]   ;;  %s2638_s12 = inlined_call_operand.vmem [shape: f32[2,64,32], index: 12, kind: input, shape index: {}]   ;;  %s2639_s13 = inlined_call_operand.vmem [shape: f32[2,1,32], index: 13, kind: input, shape index: {}]   ;;  %s2640_s14 = inlined_call_operand.vmem [shape: f32[2,1,32], index: 14, kind: input, shape index: {}]   ;;  %s2641_s15 = inlined_call_operand.hbm [shape: f32[2,1,32], index: 15, kind: input, shape index: {}]   ;;  %s2642_s16 = inlined_call_operand.vmem [shape: f32[32,32], index: 16, kind: input, shape index: {}]   ;;  %s2643_s17 = inlined_call_operand.vmem [shape: f32[1,32], index: 17, kind: input, shape index: {}]   ;;  %s2644_s18 = inlined_call_operand.vmem [shape: f32[32,1], index: 18, kind: input, shape index: {}]   ;;  %s2645_s19 = inlined_call_operand.<no memory space> [shape: f32[1,1], index: 19, kind: input, shape index: {}]   ;;  %s2646_s20 = inlined_call_operand.vmem [shape: f32[2,1], index: 20, kind: output, shape index: {}]  }
   0x1   :  { %2648 = sst [smem:[#allocation14_spill]] %s2626_s0  ;;  %v25_v0 = vstv %s2645_s19 }
   0x2   :  { %2649 = sst [smem:[#allocation15_spill]] %s2627_s1  ;;  %26 = vst [vmem:[#allocation2] sm:$0x1] %v25_v0 }
   0x3   :  { %2650 = sst [smem:[#allocation16_spill]] %s2628_s2 }
   0x4   :  { %2651 = sst [smem:[#allocation17_spill]] %s2629_s3 }
   0x5   :  { %2652 = sst [smem:[#allocation18_spill]] %s2630_s4 }
   0x6   :  { %2653 = sst [smem:[#allocation19_spill]] %s2643_s17 }
   0x7   :  { %2654 = sst [smem:[#allocation20_spill]] %s2646_s20 }
   0x8   :  { %27 = vsyncpa [#allocation4], 0 }
   0x9   :  { %28 = vsyncpa [#allocation6], 0  ;;  %s2655_s2 = sld [smem:[#allocation15_spill]] }
   0xf   :  { %s48_s25 = sshll.u32 %s2655_s2, 4  ;;  %s49_s25 = int_to_ptr.hbm [resolvable:$true] %s48_s25 }
  0x10   :  { %29 = vsyncpa [#allocation9], 0  ;;  %s2039_s3 = smov [#allocation5]   ;;  %s81_s4 = sshll.u32 %s2635_s9, 4  ;;  %s82_s4 = int_to_ptr.hbm [resolvable:$true] %s81_s4 }
  0x11   :  { %s50_s26 = sshll.u32 %s2039_s3, 4  ;;  %s2040_s29 = smov [#allocation8]   ;;  %s51_s26 = int_to_ptr.vmem [resolvable:$true] %s50_s26 }
  0x12   :  { %53 = dma.hbm_to_vmem [thread:$0]  %s49_s25, 32, %s51_s26, [#allocation6]  }
  0x13   :  { %s83_s19 = sshll.u32 %s2040_s29, 4  ;;  %s2041_s30 = smov 16   ;;  %s84_s19 = int_to_ptr.vmem [resolvable:$true] %s83_s19 }
  0x14   :  { %s2042_s0 = smov 1   ;;  %s2656_s22 = sld [smem:[#allocation14_spill]] }
  0x15   :  { %89 = dma.hbm_to_vmem [thread:$0]  %s82_s4, 32, %s84_s19, [#allocation9], %s2041_s30, %s2041_s30, %s2042_s0  }
  0x16   :  { %s2043_s24 = smov [#allocation3]   ;;  %s2657_s27 = sld [smem:[#allocation17_spill]] }
  0x17   :  { %s36_s2 = sshll.u32 %s2043_s24, 4  ;;  %s2044_s25 = smov 128   ;;  %s37_s2 = int_to_ptr.vmem [resolvable:$true] %s36_s2 }
  0x18   :  { %s2045_s26 = smov 8   ;;  %s2046_s28 = smov [#allocation7]  }
  0x19   :  { %s63_s29 = sshll.u32 %s2046_s28, 4  ;;  %s104_s19 = sshll.u32 %s2641_s15, 4  ;;  %s64_s29 = int_to_ptr.vmem [resolvable:$true] %s63_s29  ;;  %s105_s19 = int_to_ptr.hbm [resolvable:$true] %s104_s19 }
  0x1a   :  { %s34_s23 = sshll.u32 %s2656_s22, 4  ;;  %s2047_s21 = smov [#allocation10]   ;;  %s35_s23 = int_to_ptr.hbm [resolvable:$true] %s34_s23 }
  0x1b   :  { %42 = dma.hbm_to_vmem [thread:$0]  %s35_s23, 256, %s37_s2, [#allocation4], %s2044_s25, %s2044_s25, %s2045_s26  }
  0x1c   :  { %s61_s9 = sshll.u32 %s2657_s27, 4  ;;  %s106_s1 = sshll.u32 %s2047_s21, 4  ;;  %s62_s9 = int_to_ptr.hbm [resolvable:$true] %s61_s9  ;;  %s107_s1 = int_to_ptr.vmem [resolvable:$true] %s106_s1 }
  0x1d   :  { %66 = dma.hbm_to_vmem [thread:$0]  %s62_s9, 16, %s64_s29, [#allocation6]  }
  0x1e   :  { %112 = dma.hbm_to_vmem [thread:$0]  %s105_s19, 32, %s107_s1, [#allocation9], %s2041_s30, %s2041_s30, %s2042_s0  }
  0x1f   :  { %2033 = dma.done.wait [#allocation4], 256  }
  0x20   :  { %2034 = vsyncadd [#allocation4], 4294967040 }
  0x21   :  { %2035 = dma.done.wait [#allocation6], 48  }
  0x22   :  { %2036 = vsyncadd [#allocation6], 4294967248 }
  0x23   :  { %2037 = dma.done.wait [#allocation9], 64  }
  0x24   :  { %2038 = vsyncadd [#allocation9], 4294967232  ;;  %vm145_vm0 = vcmask 261120   ;;  %v141_v1 = vld [vmem:[#allocation3] sm:$0xff]  ;;  %v142_v2 = vld [vmem:[#allocation3 + $0x8] sm:$0xff]  ;;  %v2048_v5 = vmov 32.0  }
  0x25   :  { %v146_v3 = vsel %vm145_vm0, %v141_v1, 0.0  ;;  %v149_v4 = vsel %vm145_vm0, %v142_v2, 0.0  ;;  %1837 = vrcp.f32 %v2048_v5  ;;  %s2658_s20 = sld [smem:[#allocation18_spill]]  ;;  %v1818_v44 = vld [vmem:[#allocation7] ss:$0 sm:$0xff]  ;;  %s2049_s28 = smov 80  }
  0x26   :  { %147 = vadd.xlane.f32.xlu0 %v146_v3  ;;  %s2659_s9 = sld [smem:[#allocation16_spill]]  ;;  %v1819_v54 = vld [vmem:[%s2631_s5] ss:$0 sm:$0xff]  ;;  %s2050_s29 = smov 112   ;;  %vm256_vm8 = vcmask 130048   ;;  %vm316_vm9 = vcmask 64512  }
  0x27   :  { %s2051_s4 = smov 96   ;;  %s2052_s19 = smov 64  }
  0x28   :  { %s2053_s21 = smov 48   ;;  %s2665_s3 = sld [smem:[#allocation20_spill]] }
  0x2b   :  { %v1838_v6 = vpop.eup %1837  ;;  %v219_v22 = vld [vmem:[%s2658_s20 + $0x18] sm:$0xff]  ;;  %v218_v23 = vld [vmem:[%s2658_s20 + $0x10] sm:$0xff]  ;;  %v217_v24 = vld [vmem:[%s2658_s20 + $0x8] sm:$0xff] }
  0x2c   :  { %v153_v7 = vmul.f32 32.0, %v1838_v6  ;;  %vm157_vm1 = vweird.f32 %v1838_v6  ;;  %242 = vmatpush.msra.mxu0 %v219_v22  ;;  %v216_v25 = vld [vmem:[%s2658_s20] sm:$0xff] }
  0x2d   :  { %v1817_v40 = vld [vmem:[%s2659_s9] ss:$0 sm:$0xff] }
  0x2e   :  { %150 = vadd.xlane.f32.xlu0 %v149_v4  ;;  %v154_v8 = vsub.f32 1.0, %v153_v7  ;;  %243 = vmatpush.msra.mxu0 %v218_v23 }
  0x30   :  { %v155_v9 = vmul.f32 %v1838_v6, %v154_v8  ;;  %244 = vmatpush.msra.mxu0 %v217_v24 }
  0x32   :  { %v156_v10 = vadd.f32 %v1838_v6, %v155_v9  ;;  %245 = vmatpush.msra.mxu0 %v216_v25 }
  0x34   :  { %v2179_v11 = vsel %vm157_vm1, %v1838_v6, %v156_v10 }
  0x99   :  { %v148_v12 = vpop.xlane.xlu0 %147 }
  0x9a   :  { %v159_v13 = vmul.f32 %v2179_v11, %v148_v12 }
  0x9c   :  { %v161_v14 = vsub.f32 %v141_v1, %v159_v13  ;;  %v207_v1 = vld [vmem:[#allocation5] sm:$0x3] }
  0x9e   :  { %v163_v15 = vmul.f32 %v161_v14, %v161_v14 }
  0xa0   :  { %v165_v16 = vsel %vm145_vm0, %v163_v15, 0.0 }
  0xa1   :  { %166 = vadd.xlane.f32.xlu1 %v165_v16  ;;  %v151_v17 = vpop.xlane.xlu0 %150 }
  0xa2   :  { %v160_v18 = vmul.f32 %v2179_v11, %v151_v17 }
  0xa4   :  { %v162_v19 = vsub.f32 %v142_v2, %v160_v18  ;;  %v208_v2 = vsub.f32 1.0, %v207_v1 }
  0xa6   :  { %v164_v20 = vmul.f32 %v162_v19, %v162_v19  ;;  %v209_v3 = vmul.f32 -1e+09, %v208_v2 }
  0xa8   :  { %v168_v21 = vsel %vm145_vm0, %v164_v20, 0.0  ;;  %v211_v4 = vrot.slane %v209_v3, 1  ;;  %v2235_v8 = vperm.slane %v209_v3, 0 }
  0xa9   :  { %169 = vadd.xlane.f32.xlu1 %v168_v21 }
  0xaa   :  { %v2233_v5 = vperm.slane %v211_v4, 0 }
 0x114   :  { %v167_v26 = vpop.xlane.xlu1 %166 }
 0x115   :  { %v171_v27 = vmul.f32 %v167_v26, %v2179_v11 }
 0x117   :  { %v173_v28 = vadd.f32 1e-12, %v171_v27 }
 0x119   :  { %1839 = vrsqrt.f32 %v173_v28  ;;  %vm181_vm3 = vweird.f32 %v173_v28 }
 0x11c   :  { %v170_v29 = vpop.xlane.xlu1 %169 }
 0x11d   :  { %v172_v30 = vmul.f32 %v170_v29, %v2179_v11 }
 0x11f   :  { %v1840_v31 = vpop.eup %1839  ;;  %v174_v32 = vadd.f32 1e-12, %v172_v30 }
 0x120   :  { %v176_v33 = vmul.f32 %v1840_v31, %v173_v28  ;;  %vm182_vm2 = vweird.f32 %v1840_v31 }
 0x121   :  { %1841 = vrsqrt.f32 %v174_v32  ;;  %vm183_vm4 = vmor %vm181_vm3, %vm182_vm2  ;;  %vm191_vm6 = vweird.f32 %v174_v32 }
 0x122   :  { %v177_v34 = vmul.f32 %v1840_v31, %v176_v33 }
 0x124   :  { %v178_v35 = vmul.f32 0.5, %v177_v34 }
 0x126   :  { %v179_v36 = vsub.f32 1.5, %v178_v35 }
 0x127   :  { %v1842_v37 = vpop.eup %1841 }
 0x128   :  { %v180_v38 = vmul.f32 %v1840_v31, %v179_v36  ;;  %v186_v39 = vmul.f32 %v1842_v37, %v174_v32  ;;  %vm192_vm5 = vweird.f32 %v1842_v37 }
 0x129   :  { %vm193_vm7 = vmor %vm191_vm6, %vm192_vm5 }
 0x12a   :  { %v184_v41 = vsel %vm183_vm4, %v1840_v31, %v180_v38  ;;  %v187_v42 = vmul.f32 %v1842_v37, %v186_v39 }
 0x12b   :  { %v195_v43 = vmul.f32 %v184_v41, %v161_v14 }
 0x12c   :  { %v188_v45 = vmul.f32 0.5, %v187_v42 }
 0x12d   :  { %v200_v46 = vmul.f32 %v1817_v40, %v195_v43 }
 0x12e   :  { %v189_v47 = vsub.f32 1.5, %v188_v45 }
 0x12f   :  { %v2202_v48 = vadd.f32 %v1818_v44, %v200_v46 }
 0x130   :  { %v190_v49 = vmul.f32 %v1842_v37, %v189_v47 }
 0x131   :  { %1720 = vmatmul.msk.f32.vlgmr.msra.gmra.mxu0 %vm145_vm0, %v2202_v48 }
 0x132   :  { %v194_v50 = vsel %vm193_vm7, %v1842_v37, %v190_v49 }
 0x133   :  { %v196_v51 = vmul.f32 %v194_v50, %v162_v19 }
 0x135   :  { %v201_v52 = vmul.f32 %v1817_v40, %v196_v51 }
 0x137   :  { %v2206_v53 = vadd.f32 %v1818_v44, %v201_v52 }
 0x139   :  { %1721 = vmatmul.msk.f32.gmra.mxu0 %vm145_vm0, %v2206_v53 }
 0x1ae   :  { %v247_v55 = vpop.f32.mrf.mxu0 }
 0x1af   :  { %v2213_v56 = vadd.f32 %v1819_v54, %v247_v55 }
 0x1b1   :  { %419 = vrot.lane.b32.xlu0 %v2213_v56, %s2049_s28  ;;  %417 = vrot.lane.b32.xlu1 %v2213_v56, %s2050_s29 }
 0x1b6   :  { %v250_v57 = vpop.f32.mrf.mxu0 }
 0x1b7   :  { %v251_v58 = vadd.f32 %v1819_v54, %v250_v57 }
 0x1b9   :  { %282 = vrot.lane.b32.xlu2 %v251_v58, %s2051_s4 }
 0x1c1   :  { %254 = vrot.lane.b32.xlu2 %v2213_v56, %s2051_s4 }
 0x1c9   :  { %447 = vrot.lane.b32.xlu2 %v251_v58, %s2049_s28 }
 0x1d1   :  { %445 = vrot.lane.b32.xlu2 %v251_v58, %s2050_s29 }
 0x213   :  { %v283_v59 = vpop.permute.xlu2 %282 }
 0x214   :  { %1724 = vmatpush.xpose.msk.msra.mxu2 %vm256_vm8, %v283_v59 }
 0x217   :  { %1725 = vmatmul.msk.f32.vlgmr.msra.gmra.mxu2 %vm256_vm8, %v251_v58 }
 0x21b   :  { %v255_v60 = vpop.permute.xlu2 %254 }
 0x21c   :  { %1722 = vmatpush.xpose.msk.msra.mxu1 %vm256_vm8, %v255_v60 }
 0x21f   :  { %1723 = vmatmul.msk.f32.vlgmr.msra.gmra.mxu1 %vm256_vm8, %v2213_v56 }
 0x223   :  { %v448_v61 = vpop.permute.xlu2 %447  ;;  %v420_v62 = vpop.permute.xlu0 %419 }
 0x224   :  { %1730 = vmatpush.xpose.msk.msrb.mxu2 %vm256_vm8, %v448_v61  ;;  %1728 = vmatpush.xpose.msk.msrb.mxu1 %vm256_vm8, %v420_v62  ;;  %v418_v63 = vpop.permute.xlu1 %417 }
 0x227   :  { %1729 = vmatmul.msk.f32.vlgmr.msrb.gmra.mxu1 %vm256_vm8, %v418_v63 }
 0x22b   :  { %v446_v0 = vpop.permute.xlu2 %445 }
 0x22c   :  { %1731 = vmatmul.msk.f32.vlgmr.msrb.gmra.mxu2 %vm256_vm8, %v446_v0 }
 0x29a   :  { %v305_v6 = vpop.f32.mrf.mxu2 }
 0x29b   :  { %v309_v7 = vmul.f32 0.25, %v305_v6 }
 0x29c   :  { %v278_v9 = vpop.f32.mrf.mxu1 }
 0x29d   :  { %v308_v10 = vmul.f32 0.25, %v278_v9  ;;  %v315_v12 = vadd.f32 %v2233_v5, %v309_v7 }
 0x29f   :  { %v320_v13 = vsel %vm316_vm9, %v315_v12, -inf  ;;  %v314_v14 = vadd.f32 %v2235_v8, %v308_v10 }
 0x2a0   :  { %321 = vmax.xlane.f32.xlu2 %v320_v13 }
 0x2a1   :  { %v317_v15 = vsel %vm316_vm9, %v314_v14, -inf }
 0x2a2   :  { %318 = vmax.xlane.f32.xlu1 %v317_v15 }
 0x2a4   :  { %v442_v16 = vpop.f32.mrf.mxu1 }
 0x2a5   :  { %v473_v17 = vmul.f32 0.25, %v442_v16 }
 0x2a7   :  { %v475_v18 = vadd.f32 %v473_v17, %v2235_v8 }
 0x2a9   :  { %v477_v19 = vsel %vm316_vm9, %v475_v18, -inf }
 0x2aa   :  { %478 = vmax.xlane.f32.xlu0 %v477_v19 }
 0x2af   :  { %v470_v20 = vpop.f32.mrf.mxu2 }
 0x2b0   :  { %v474_v21 = vmul.f32 0.25, %v470_v20 }
 0x2b2   :  { %v476_v22 = vadd.f32 %v474_v21, %v2233_v5 }
 0x2b4   :  { %v480_v23 = vsel %vm316_vm9, %v476_v22, -inf }
 0x2b5   :  { %481 = vmax.xlane.f32.xlu2 %v480_v23 }
 0x2bb   :  { %391 = vrot.lane.b32.xlu1 %v251_v58, %s2052_s19 }
 0x2c3   :  { %551 = vrot.lane.b32.xlu1 %v251_v58, %s2053_s21 }
 0x313   :  { %v322_v24 = vpop.xlane.xlu2 %321 }
 0x314   :  { %v324_v27 = vsub.f32 %v315_v12, %v322_v24 }
 0x315   :  { %v319_v25 = vpop.xlane.xlu1 %318 }
 0x316   :  { %v323_v26 = vsub.f32 %v314_v14, %v319_v25  ;;  %v327_v29 = vmul.f32 1.442695, %v324_v27 }
 0x318   :  { %v325_v28 = vmul.f32 1.442695, %v323_v26  ;;  %v213_v26 = vld [vmem:[%s2632_s6 + $0x8] sm:$0xff] }
 0x31a   :  { %1843 = vpow2.f32 %v325_v28 }
 0x31b   :  { %1845 = vpow2.f32 %v327_v29 }
 0x31d   :  { %v479_v30 = vpop.xlane.xlu0 %478 }
 0x31e   :  { %v483_v31 = vsub.f32 %v475_v18, %v479_v30 }
 0x320   :  { %v2247_v32 = vpop.eup %1843  ;;  %v485_v33 = vmul.f32 1.442695, %v483_v31 }
 0x321   :  { %v329_v34 = vsel %vm316_vm9, %v2247_v32, 0.0  ;;  %v2251_v35 = vpop.eup %1845 }
 0x322   :  { %330 = vadd.xlane.f32.xlu0 %v329_v34  ;;  %1847 = vpow2.f32 %v485_v33  ;;  %v332_v39 = vsel %vm316_vm9, %v2251_v35, 0.0 }
 0x328   :  { %v482_v36 = vpop.xlane.xlu2 %481  ;;  %v2253_v37 = vpop.eup %1847 }
 0x329   :  { %v484_v38 = vsub.f32 %v476_v22, %v482_v36  ;;  %v489_v40 = vsel %vm316_vm9, %v2253_v37, 0.0 }
 0x32a   :  { %333 = vadd.xlane.f32.xlu0 %v332_v39  ;;  %490 = vadd.xlane.f32.xlu2 %v489_v40 }
 0x32b   :  { %v487_v41 = vmul.f32 1.442695, %v484_v38 }
 0x32d   :  { %1849 = vpow2.f32 %v487_v41  ;;  %v392_v42 = vpop.permute.xlu1 %391  ;;  %v212_v41 = vld [vmem:[%s2632_s6] sm:$0xff] }
 0x32e   :  { %412 = vmatpush.msra.mxu3 %v392_v42  ;;  %v215_v42 = vld [vmem:[%s2632_s6 + $0x18] sm:$0xff] }
 0x32f   :  { %597 = vmatpush.msra.mxu2 %v215_v42  ;;  %v1823_v42 = vld [vmem:[%s2637_s11] ss:$0 sm:$0xff] }
 0x333   :  { %v2259_v43 = vpop.eup %1849 }
 0x334   :  { %v492_v44 = vsel %vm316_vm9, %v2259_v43, 0.0 }
 0x335   :  { %v552_v45 = vpop.permute.xlu1 %551  ;;  %493 = vadd.xlane.f32.xlu2 %v492_v44 }
 0x336   :  { %572 = vmatpush.msra.mxu1 %v552_v45 }
 0x33e   :  { %525 = vrot.lane.b32.xlu0 %v2213_v56, %s2053_s21 }
 0x34d   :  { %365 = vrot.lane.b32.xlu2 %v2213_v56, %s2052_s19 }
 0x395   :  { %v331_v46 = vpop.xlane.xlu0 %330 }
 0x396   :  { %1851 = vrcp.f32 %v331_v46  ;;  %vm340_vm11 = vweird.f32 %v331_v46  ;;  %v346_v61 = vand.u32 2147483648, %v331_v46  ;;  %v344_v56 = vand.u32 2147483647, %v331_v46 }
 0x398   :  { %v347_v9 = vor.u32 1.1754944e-38, %v346_v61  ;;  %vm345_vm15 = vcmp.eq.f32.partialorder %v344_v56, 8.507059e+37 }
 0x39c   :  { %v1852_v47 = vpop.eup %1851 }
 0x39d   :  { %v336_v49 = vmul.f32 %v1852_v47, %v331_v46  ;;  %v334_v50 = vpop.xlane.xlu0 %333  ;;  %v491_v51 = vpop.xlane.xlu2 %490  ;;  %vm341_vm10 = vweird.f32 %v1852_v47 }
 0x39e   :  { %1853 = vrcp.f32 %v334_v50  ;;  %v361_v0 = vand.u32 2147483648, %v334_v50  ;;  %v359_v2 = vand.u32 2147483647, %v334_v50  ;;  %vm2267_vm12 = vmor %vm340_vm11, %vm341_vm10  ;;  %vm355_vm14 = vweird.f32 %v334_v50 }
 0x39f   :  { %v337_v52 = vsub.f32 1.0, %v336_v49  ;;  %1855 = vrcp.f32 %v491_v51  ;;  %v506_v16 = vand.u32 2147483648, %v491_v51  ;;  %vm500_vm4 = vweird.f32 %v491_v51  ;;  %v1820_v49 = vld [vmem:[%s2633_s7] ss:$0 sm:$0xff] }
 0x3a0   :  { %v362_v12 = vor.u32 1.1754944e-38, %v361_v0  ;;  %vm360_vm2 = vcmp.eq.f32.partialorder %v359_v2, 8.507059e+37  ;;  %v504_v19 = vand.u32 2147483647, %v491_v51 }
 0x3a1   :  { %v338_v54 = vmul.f32 %v1852_v47, %v337_v52  ;;  %v507_v28 = vor.u32 1.1754944e-38, %v506_v16 }
 0x3a2   :  { %vm505_vm6 = vcmp.eq.f32.partialorder %v504_v19, 8.507059e+37 }
 0x3a3   :  { %v339_v59 = vadd.f32 %v1852_v47, %v338_v54 }
 0x3a4   :  { %v1854_v55 = vpop.eup %1853 }
 0x3a5   :  { %v1856_v57 = vpop.eup %1855  ;;  %v351_v58 = vmul.f32 %v1854_v55, %v334_v50  ;;  %vm356_vm13 = vweird.f32 %v1854_v55  ;;  %v343_v7 = vsel %vm2267_vm12, %v1852_v47, %v339_v59 }
 0x3a6   :  { %v496_v60 = vmul.f32 %v1856_v57, %v491_v51  ;;  %vm357_vm1 = vmor %vm355_vm14, %vm356_vm13  ;;  %vm501_vm3 = vweird.f32 %v1856_v57  ;;  %v348_v15 = vsel %vm345_vm15, %v347_v9, %v343_v7  ;;  %v701_v9 = vld [vmem:[%s2636_s10 + $0x10] sm:$0xff] }
 0x3a7   :  { %v352_v62 = vsub.f32 1.0, %v351_v58  ;;  %vm2274_vm5 = vmor %vm500_vm4, %vm501_vm3  ;;  %v349_v25 = vmul.f32 %v2247_v32, %v348_v15 }
 0x3a8   :  { %v497_v63 = vsub.f32 1.0, %v496_v60  ;;  %v494_v1 = vpop.xlane.xlu2 %493 }
 0x3a9   :  { %v353_v4 = vmul.f32 %v1854_v55, %v352_v62  ;;  %1857 = vrcp.f32 %v494_v1  ;;  %v521_v30 = vand.u32 2147483648, %v494_v1  ;;  %v519_v32 = vand.u32 2147483647, %v494_v1 }
 0x3aa   :  { %v498_v6 = vmul.f32 %v1856_v57, %v497_v63  ;;  %vm515_vm10 = vweird.f32 %v494_v1 }
 0x3ab   :  { %v354_v10 = vadd.f32 %v1854_v55, %v353_v4  ;;  %vm520_vm12 = vcmp.eq.f32.partialorder %v519_v32, 8.507059e+37 }
 0x3ac   :  { %v499_v13 = vadd.f32 %v1856_v57, %v498_v6 }
 0x3ad   :  { %v358_v14 = vsel %vm357_vm1, %v1854_v55, %v354_v10  ;;  %v700_v10 = vld [vmem:[%s2636_s10 + $0x8] sm:$0xff] }
 0x3ae   :  { %v363_v17 = vsel %vm360_vm2, %v362_v12, %v358_v14  ;;  %v503_v27 = vsel %vm2274_vm5, %v1856_v57, %v499_v13  ;;  %v699_v12 = vld [vmem:[%s2636_s10] sm:$0xff] }
 0x3af   :  { %v1858_v18 = vpop.eup %1857  ;;  %v364_v20 = vmul.f32 %v2251_v35, %v363_v17  ;;  %v508_v33 = vsel %vm505_vm6, %v507_v28, %v503_v27  ;;  %v522_v35 = vor.u32 1.1754944e-38, %v521_v30  ;;  %v1821_v27 = vld [vmem:[%s2634_s8] ss:$0 sm:$0xff] }
 0x3b0   :  { %v511_v22 = vmul.f32 %v1858_v18, %v494_v1  ;;  %v366_v23 = vpop.permute.xlu2 %365  ;;  %v526_v24 = vpop.permute.xlu0 %525  ;;  %vm516_vm7 = vweird.f32 %v1858_v18  ;;  %v509_v36 = vmul.f32 %v2253_v37, %v508_v33  ;;  %v214_v37 = vld [vmem:[%s2632_s6 + $0x10] sm:$0xff] }
 0x3b1   :  { %386 = vmatpush.msrb.mxu0 %v366_v23  ;;  %1727 = vmatmul.msk.f32.vlgmr.msra.gmra.mxu3 %vm316_vm9, %v364_v20  ;;  %vm517_vm11 = vmor %vm515_vm10, %vm516_vm7 }
 0x3b2   :  { %v512_v29 = vsub.f32 1.0, %v511_v22  ;;  %546 = vmatpush.msrb.mxu3 %v526_v24  ;;  %1726 = vmatmul.msk.f32.vlgmr.msrb.gmra.mxu0 %vm316_vm9, %v349_v25 }
 0x3b3   :  { %626 = vmatpush.msra.mxu0 %v213_v26  ;;  %598 = vmatpush.msra.mxu2 %v214_v37 }
 0x3b4   :  { %v513_v31 = vmul.f32 %v1858_v18, %v512_v29 }
 0x3b5   :  { %627 = vmatpush.msra.mxu0 %v212_v41 }
 0x3b6   :  { %v514_v34 = vadd.f32 %v1858_v18, %v513_v31  ;;  %v1822_v31 = vld [vmem:[#allocation8] ss:$0 sm:$0xff] }
 0x3b8   :  { %v518_v38 = vsel %vm517_vm11, %v1858_v18, %v514_v34 }
 0x3b9   :  { %v523_v39 = vsel %vm520_vm12, %v522_v35, %v518_v38  ;;  %1732 = vmatmul.msk.f32.vlgmr.msrb.gmra.mxu3 %vm316_vm9, %v509_v36 }
 0x3ba   :  { %v524_v40 = vmul.f32 %v2259_v43, %v523_v39 }
 0x3bc   :  { %1733 = vmatmul.msk.f32.vlgmr.msra.gmra.mxu1 %vm316_vm9, %v524_v40 }
 0x42f   :  { %v388_v44 = vpop.f32.mrf.mxu0 }
 0x430   :  { %1736 = vmatmul.msk.f32.vlgmr.msra.gmra.mxu0 %vm256_vm8, %v388_v44 }
 0x434   :  { %v414_v43 = vpop.f32.mrf.mxu3 }
 0x438   :  { %1737 = vmatmul.msk.f32.gmra.mxu0 %vm256_vm8, %v414_v43 }
 0x439   :  { %v574_v46 = vpop.f32.mrf.mxu1 }
 0x43c   :  { %v548_v45 = vpop.f32.mrf.mxu3 }
 0x43d   :  { %1734 = vmatmul.msk.f32.vlgmr.msra.gmra.mxu2 %vm256_vm8, %v548_v45 }
 0x445   :  { %1735 = vmatmul.msk.f32.gmra.mxu2 %vm256_vm8, %v574_v46 }
 0x4ad   :  { %v629_v47 = vpop.f32.mrf.mxu0 }
 0x4b5   :  { %v632_v57 = vpop.f32.mrf.mxu0 }
 0x4c0   :  { %v600_v50 = vpop.f32.mrf.mxu2 }
 0x4c1   :  { %v630_v51 = vadd.f32 %v629_v47, %v600_v50 }
 0x4c3   :  { %v639_v52 = vadd.f32 %v1820_v49, %v630_v51  ;;  %v823_v51 = vld [vmem:[%s2638_s12 + $0x38] sm:$0xff] }
 0x4c4   :  { %843 = vmatpush.msrb.mxu1 %v823_v51 }
 0x4c5   :  { %v641_v54 = vadd.f32 %v639_v52, %v2202_v48 }
 0x4c7   :  { %v645_v55 = vsel %vm145_vm0, %v641_v54, 0.0 }
 0x4c8   :  { %646 = vadd.xlane.f32.xlu0 %v645_v55  ;;  %v603_v58 = vpop.f32.mrf.mxu2 }
 0x4c9   :  { %v633_v59 = vadd.f32 %v632_v57, %v603_v58  ;;  %v821_v57 = vld [vmem:[%s2638_s12 + $0x28] sm:$0xff] }
 0x4cb   :  { %v640_v60 = vadd.f32 %v1820_v49, %v633_v59 }
 0x4cd   :  { %v642_v61 = vadd.f32 %v640_v60, %v2206_v53  ;;  %v702_v53 = vld [vmem:[%s2636_s10 + $0x18] sm:$0xff]  ;;  %v820_v60 = vld [vmem:[%s2638_s12 + $0x20] sm:$0xff] }
 0x4ce   :  { %725 = vmatpush.msra.mxu3 %v702_v53 }
 0x4cf   :  { %v648_v62 = vsel %vm145_vm0, %v642_v61, 0.0 }
 0x4d0   :  { %649 = vadd.xlane.f32.xlu1 %v648_v62  ;;  %726 = vmatpush.msra.mxu3 %v701_v9 }
 0x4d2   :  { %727 = vmatpush.msra.mxu3 %v700_v10 }
 0x4d4   :  { %728 = vmatpush.msra.mxu3 %v699_v12 }
 0x53b   :  { %v647_v56 = vpop.xlane.xlu0 %646 }
 0x53c   :  { %v651_v63 = vmul.f32 %v647_v56, %v2179_v11  ;;  %v819_v56 = vld [vmem:[%s2638_s12 + $0x18] sm:$0xff] }
 0x53e   :  { %v653_v0 = vsub.f32 %v641_v54, %v651_v63  ;;  %v822_v54 = vld [vmem:[%s2638_s12 + $0x30] sm:$0xff] }
 0x53f   :  { %844 = vmatpush.msrb.mxu1 %v822_v54 }
 0x540   :  { %v655_v1 = vmul.f32 %v653_v0, %v653_v0 }
 0x541   :  { %845 = vmatpush.msrb.mxu1 %v821_v57 }
 0x542   :  { %v657_v2 = vsel %vm145_vm0, %v655_v1, 0.0  ;;  %v818_v1 = vld [vmem:[%s2638_s12 + $0x10] sm:$0xff] }
 0x543   :  { %658 = vadd.xlane.f32.xlu2 %v657_v2  ;;  %v650_v48 = vpop.xlane.xlu1 %649  ;;  %846 = vmatpush.msrb.mxu1 %v820_v60 }
 0x544   :  { %v652_v3 = vmul.f32 %v650_v48, %v2179_v11 }
 0x545   :  { %847 = vmatpush.msrb.mxu1 %v819_v56 }
 0x546   :  { %v654_v4 = vsub.f32 %v642_v61, %v652_v3  ;;  %v817_v3 = vld [vmem:[%s2638_s12 + $0x8] sm:$0xff] }
 0x547   :  { %848 = vmatpush.msrb.mxu1 %v818_v1 }
 0x548   :  { %v656_v6 = vmul.f32 %v654_v4, %v654_v4 }
 0x549   :  { %849 = vmatpush.msrb.mxu1 %v817_v3 }
 0x54a   :  { %v660_v7 = vsel %vm145_vm0, %v656_v6, 0.0 }
 0x54b   :  { %661 = vadd.xlane.f32.xlu0 %v660_v7 }
 0x5b6   :  { %v659_v13 = vpop.xlane.xlu2 %658 }
 0x5b7   :  { %v663_v14 = vmul.f32 %v659_v13, %v2179_v11 }
 0x5b9   :  { %v665_v15 = vadd.f32 1e-12, %v663_v14 }
 0x5bb   :  { %1859 = vrsqrt.f32 %v665_v15  ;;  %vm673_vm14 = vweird.f32 %v665_v15 }
 0x5be   :  { %v662_v16 = vpop.xlane.xlu0 %661 }
 0x5bf   :  { %v664_v17 = vmul.f32 %v662_v16, %v2179_v11 }
 0x5c1   :  { %v1860_v18 = vpop.eup %1859  ;;  %v666_v19 = vadd.f32 1e-12, %v664_v17 }
 0x5c2   :  { %v668_v20 = vmul.f32 %v1860_v18, %v665_v15  ;;  %vm674_vm13 = vweird.f32 %v1860_v18 }
 0x5c3   :  { %1861 = vrsqrt.f32 %v666_v19  ;;  %vm675_vm15 = vmor %vm673_vm14, %vm674_vm13  ;;  %vm683_vm2 = vweird.f32 %v666_v19 }
 0x5c4   :  { %v669_v21 = vmul.f32 %v1860_v18, %v668_v20 }
 0x5c6   :  { %v670_v22 = vmul.f32 0.5, %v669_v21 }
 0x5c8   :  { %v671_v23 = vsub.f32 1.5, %v670_v22 }
 0x5c9   :  { %v1862_v24 = vpop.eup %1861 }
 0x5ca   :  { %v672_v25 = vmul.f32 %v1860_v18, %v671_v23  ;;  %v678_v26 = vmul.f32 %v1862_v24, %v666_v19  ;;  %vm684_vm1 = vweird.f32 %v1862_v24 }
 0x5cb   :  { %vm685_vm3 = vmor %vm683_vm2, %vm684_vm1 }
 0x5cc   :  { %v676_v28 = vsel %vm675_vm15, %v1860_v18, %v672_v25  ;;  %v679_v29 = vmul.f32 %v1862_v24, %v678_v26  ;;  %vm828_vm15 = vcmask 523264  }
 0x5cd   :  { %v687_v30 = vmul.f32 %v676_v28, %v653_v0 }
 0x5ce   :  { %v680_v32 = vmul.f32 0.5, %v679_v29 }
 0x5cf   :  { %v692_v33 = vmul.f32 %v1821_v27, %v687_v30 }
 0x5d0   :  { %v681_v34 = vsub.f32 1.5, %v680_v32 }
 0x5d1   :  { %v2331_v35 = vadd.f32 %v1822_v31, %v692_v33 }
 0x5d2   :  { %v682_v36 = vmul.f32 %v1862_v24, %v681_v34 }
 0x5d3   :  { %1738 = vmatmul.msk.f32.vlgmr.msra.gmra.mxu3 %vm145_vm0, %v2331_v35 }
 0x5d4   :  { %v686_v38 = vsel %vm685_vm3, %v1862_v24, %v682_v36 }
 0x5d5   :  { %v688_v39 = vmul.f32 %v686_v38, %v654_v4  ;;  %v816_v4 = vld [vmem:[%s2638_s12] sm:$0xff] }
 0x5d6   :  { %850 = vmatpush.msrb.mxu1 %v816_v4 }
 0x5d7   :  { %v693_v40 = vmul.f32 %v1821_v27, %v688_v39 }
 0x5d9   :  { %v2335_v41 = vadd.f32 %v1822_v31, %v693_v40 }
 0x5db   :  { %1739 = vmatmul.msk.f32.gmra.mxu3 %vm145_vm0, %v2335_v41 }
 0x656   :  { %v730_v37 = vpop.f32.mrf.mxu3 }
 0x657   :  { %v2342_v44 = vadd.f32 %v1823_v42, %v730_v37 }
 0x659   :  { %v2345_v43 = vmul.f32 0.70710677, %v2342_v44 }
 0x65b   :  { %v740_v45 = vand.u32 2147483647, %v2345_v43  ;;  %vm806_vm14 = vcmp.ge.f32.partialorder %v2345_v43, 0.0 }
 0x65d   :  { %v742_v46 = vmul.f32 0.3275911, %v740_v45  ;;  %v794_v12 = vsub.f32 0.0, %v740_v45 }
 0x65e   :  { %v733_v47 = vpop.f32.mrf.mxu3 }
 0x65f   :  { %v744_v49 = vadd.f32 1.0, %v742_v46  ;;  %v2348_v50 = vadd.f32 %v1823_v42, %v733_v47  ;;  %v796_v18 = vmul.f32 %v794_v12, %v740_v45 }
 0x661   :  { %1863 = vrcp.f32 %v744_v49  ;;  %v2354_v52 = vmul.f32 0.70710677, %v2348_v50  ;;  %v757_v0 = vand.u32 2147483648, %v744_v49  ;;  %v755_v48 = vand.u32 2147483647, %v744_v49 }
 0x662   :  { %vm751_vm5 = vweird.f32 %v744_v49  ;;  %v798_v25 = vmul.f32 1.442695, %v796_v18 }
 0x663   :  { %v741_v55 = vand.u32 2147483647, %v2354_v52  ;;  %v758_v7 = vor.u32 1.1754944e-38, %v757_v0  ;;  %vm756_vm7 = vcmp.eq.f32.partialorder %v755_v48, 8.507059e+37  ;;  %vm807_vm1 = vcmp.ge.f32.partialorder %v2354_v52, 0.0 }
 0x665   :  { %v743_v58 = vmul.f32 0.3275911, %v741_v55  ;;  %v795_v28 = vsub.f32 0.0, %v741_v55 }
 0x667   :  { %v1864_v59 = vpop.eup %1863  ;;  %v745_v62 = vadd.f32 1.0, %v743_v58  ;;  %v797_v34 = vmul.f32 %v795_v28, %v741_v55 }
 0x668   :  { %v747_v61 = vmul.f32 %v1864_v59, %v744_v49  ;;  %vm752_vm4 = vweird.f32 %v1864_v59 }
 0x669   :  { %1865 = vrcp.f32 %v745_v62  ;;  %vm753_vm6 = vmor %vm751_vm5, %vm752_vm4  ;;  %v772_v17 = vand.u32 2147483648, %v745_v62  ;;  %v770_v20 = vand.u32 2147483647, %v745_v62  ;;  %vm766_vm11 = vweird.f32 %v745_v62 }
 0x66a   :  { %v748_v63 = vsub.f32 1.0, %v747_v61  ;;  %1867 = vpow2.f32 %v798_v25  ;;  %v800_v42 = vmul.f32 1.442695, %v797_v34 }
 0x66b   :  { %v773_v24 = vor.u32 1.1754944e-38, %v772_v17  ;;  %vm771_vm13 = vcmp.eq.f32.partialorder %v770_v20, 8.507059e+37  ;;  %v1748_v20 = vld [vmem:[%s2658_s20 + $0x30] sm:$0xff] }
 0x66c   :  { %v749_v2 = vmul.f32 %v1864_v59, %v748_v63  ;;  %1869 = vpow2.f32 %v800_v42 }
 0x66e   :  { %v750_v6 = vadd.f32 %v1864_v59, %v749_v2  ;;  %v737_v2 = vmul.f32 0.5, %v2348_v50 }
 0x66f   :  { %v1866_v53 = vpop.eup %1865 }
 0x670   :  { %v754_v9 = vsel %vm753_vm6, %v1864_v59, %v750_v6  ;;  %v762_v13 = vmul.f32 %v1866_v53, %v745_v62  ;;  %vm767_vm10 = vweird.f32 %v1866_v53  ;;  %v1868_v37 = vpop.eup %1867  ;;  %v736_v59 = vmul.f32 0.5, %v2342_v44  ;;  %v1824_v44 = vld [vmem:[%s2639_s13] ss:$0 sm:$0xff] }
 0x671   :  { %v759_v10 = vsel %vm756_vm7, %v758_v7, %v754_v9  ;;  %vm768_vm12 = vmor %vm766_vm11, %vm767_vm10 }
 0x672   :  { %v776_v14 = vmul.f32 1.0614054, %v759_v10  ;;  %v763_v15 = vsub.f32 1.0, %v762_v13  ;;  %v1870_v61 = vpop.eup %1869 }
 0x674   :  { %v778_v16 = vadd.f32 -1.4531521, %v776_v14  ;;  %v764_v19 = vmul.f32 %v1866_v53, %v763_v15 }
 0x676   :  { %v780_v21 = vmul.f32 %v778_v16, %v759_v10  ;;  %v765_v22 = vadd.f32 %v1866_v53, %v764_v19 }
 0x678   :  { %v782_v23 = vadd.f32 1.4214138, %v780_v21  ;;  %v769_v26 = vsel %vm768_vm12, %v1866_v53, %v765_v22  ;;  %v1747_v21 = vld [vmem:[%s2658_s20 + $0x28] sm:$0xff]  ;;  %v1746_v22 = vld [vmem:[%s2658_s20 + $0x20] sm:$0xff] }
 0x679   :  { %v774_v29 = vsel %vm771_vm13, %v773_v24, %v769_v26 }
 0x67a   :  { %v784_v27 = vmul.f32 %v782_v23, %v759_v10  ;;  %v777_v30 = vmul.f32 1.0614054, %v774_v29 }
 0x67c   :  { %v786_v31 = vadd.f32 -0.28449672, %v784_v27  ;;  %v779_v32 = vadd.f32 -1.4531521, %v777_v30 }
 0x67e   :  { %v788_v33 = vmul.f32 %v786_v31, %v759_v10  ;;  %v781_v36 = vmul.f32 %v779_v32, %v774_v29 }
 0x680   :  { %v790_v38 = vadd.f32 0.2548296, %v788_v33  ;;  %v783_v39 = vadd.f32 1.4214138, %v781_v36 }
 0x682   :  { %v792_v40 = vmul.f32 %v790_v38, %v759_v10  ;;  %v785_v45 = vmul.f32 %v783_v39, %v774_v29  ;;  %v1825_v38 = vld [vmem:[%s2640_s14] ss:$0 sm:$0xff] }
 0x684   :  { %v802_v46 = vmul.f32 %v1868_v37, %v792_v40  ;;  %v787_v47 = vadd.f32 -0.28449672, %v785_v45  ;;  %v1826_v45 = vld [vmem:[#allocation10] ss:$0 sm:$0xff] }
 0x686   :  { %v804_v49 = vsub.f32 1.0, %v802_v46  ;;  %v789_v51 = vmul.f32 %v787_v47, %v774_v29 }
 0x688   :  { %v808_v54 = vsub.f32 0.0, %v804_v49  ;;  %v791_v57 = vadd.f32 0.2548296, %v789_v51 }
 0x68a   :  { %v810_v58 = vsel %vm806_vm14, %v804_v49, %v808_v54  ;;  %v793_v60 = vmul.f32 %v791_v57, %v774_v29 }
 0x68b   :  { %v812_v55 = vadd.f32 1.0, %v810_v58 }
 0x68c   :  { %v803_v56 = vmul.f32 %v1870_v61, %v793_v60  ;;  %v1827_v60 = vld [vmem:[%s2631_s5 + $0x1] ss:$0 sm:$0xff] }
 0x68d   :  { %v814_v62 = vmul.f32 %v812_v55, %v736_v59 }
 0x68e   :  { %v805_v63 = vsub.f32 1.0, %v803_v56 }
 0x68f   :  { %1740 = vmatmul.msk.f32.vlgmr.msrb.gmra.mxu1 %vm828_vm15, %v814_v62 }
 0x690   :  { %v809_v0 = vsub.f32 0.0, %v805_v63 }
 0x692   :  { %v811_v1 = vsel %vm807_vm1, %v805_v63, %v809_v0 }
 0x693   :  { %v813_v43 = vadd.f32 1.0, %v811_v1 }
 0x695   :  { %v815_v48 = vmul.f32 %v813_v43, %v737_v2 }
 0x697   :  { %1741 = vmatmul.msk.f32.gmra.mxu1 %vm828_vm15, %v815_v48 }
 0x70c   :  { %v852_v3 = vpop.f32.mrf.mxu1 }
 0x70d   :  { %v853_v4 = vadd.f32 %v1824_v44, %v852_v3 }
 0x70f   :  { %v858_v6 = vadd.f32 %v853_v4, %v2331_v35 }
 0x711   :  { %v862_v7 = vsel %vm145_vm0, %v858_v6, 0.0 }
 0x712   :  { %863 = vadd.xlane.f32.xlu1 %v862_v7 }
 0x714   :  { %v855_v53 = vpop.f32.mrf.mxu1 }
 0x715   :  { %v856_v52 = vadd.f32 %v1824_v44, %v855_v53 }
 0x717   :  { %v859_v9 = vadd.f32 %v856_v52, %v2335_v41  ;;  %v1749_v41 = vld [vmem:[%s2658_s20 + $0x38] sm:$0xff] }
 0x718   :  { %949 = vmatpush.msrb.mxu2 %v1749_v41 }
 0x719   :  { %v865_v50 = vsel %vm145_vm0, %v859_v9, 0.0 }
 0x71a   :  { %866 = vadd.xlane.f32.xlu2 %v865_v50  ;;  %950 = vmatpush.msrb.mxu2 %v1748_v20 }
 0x71c   :  { %951 = vmatpush.msrb.mxu2 %v1747_v21 }
 0x71e   :  { %952 = vmatpush.msrb.mxu2 %v1746_v22 }
 0x785   :  { %v864_v10 = vpop.xlane.xlu1 %863 }
 0x786   :  { %v868_v12 = vmul.f32 %v864_v10, %v2179_v11 }
 0x788   :  { %v870_v13 = vsub.f32 %v858_v6, %v868_v12 }
 0x78a   :  { %v872_v14 = vmul.f32 %v870_v13, %v870_v13 }
 0x78c   :  { %v874_v15 = vsel %vm145_vm0, %v872_v14, 0.0 }
 0x78d   :  { %875 = vadd.xlane.f32.xlu0 %v874_v15  ;;  %v867_v16 = vpop.xlane.xlu2 %866 }
 0x78e   :  { %v869_v35 = vmul.f32 %v867_v16, %v2179_v11 }
 0x790   :  { %v871_v17 = vsub.f32 %v859_v9, %v869_v35 }
 0x792   :  { %v873_v18 = vmul.f32 %v871_v17, %v871_v17 }
 0x794   :  { %v877_v19 = vsel %vm145_vm0, %v873_v18, 0.0 }
 0x795   :  { %878 = vadd.xlane.f32.xlu1 %v877_v19 }
 0x800   :  { %v876_v23 = vpop.xlane.xlu0 %875 }
 0x801   :  { %v880_v24 = vmul.f32 %v876_v23, %v2179_v11 }
 0x803   :  { %v882_v25 = vadd.f32 1e-12, %v880_v24 }
 0x805   :  { %1871 = vrsqrt.f32 %v882_v25  ;;  %vm890_vm3 = vweird.f32 %v882_v25 }
 0x808   :  { %v879_v26 = vpop.xlane.xlu1 %878 }
 0x809   :  { %v881_v27 = vmul.f32 %v879_v26, %v2179_v11 }
 0x80b   :  { %v1872_v28 = vpop.eup %1871  ;;  %v883_v30 = vadd.f32 1e-12, %v881_v27 }
 0x80c   :  { %v885_v29 = vmul.f32 %v1872_v28, %v882_v25  ;;  %vm891_vm2 = vweird.f32 %v1872_v28 }
 0x80d   :  { %1873 = vrsqrt.f32 %v883_v30  ;;  %vm892_vm4 = vmor %vm890_vm3, %vm891_vm2  ;;  %vm900_vm6 = vweird.f32 %v883_v30 }
 0x80e   :  { %v886_v31 = vmul.f32 %v1872_v28, %v885_v29 }
 0x810   :  { %v887_v32 = vmul.f32 0.5, %v886_v31 }
 0x812   :  { %v888_v33 = vsub.f32 1.5, %v887_v32 }
 0x813   :  { %v1874_v34 = vpop.eup %1873 }
 0x814   :  { %v889_v36 = vmul.f32 %v1872_v28, %v888_v33  ;;  %v895_v39 = vmul.f32 %v1874_v34, %v883_v30  ;;  %vm901_vm5 = vweird.f32 %v1874_v34 }
 0x815   :  { %vm902_vm7 = vmor %vm900_vm6, %vm901_vm5 }
 0x816   :  { %v893_v40 = vsel %vm892_vm4, %v1872_v28, %v889_v36  ;;  %v896_v37 = vmul.f32 %v1874_v34, %v895_v39 }
 0x817   :  { %v904_v42 = vmul.f32 %v893_v40, %v870_v13 }
 0x818   :  { %v897_v47 = vmul.f32 0.5, %v896_v37 }
 0x819   :  { %v909_v46 = vmul.f32 %v1825_v38, %v904_v42 }
 0x81a   :  { %v898_v49 = vsub.f32 1.5, %v897_v47 }
 0x81b   :  { %v2412_v51 = vadd.f32 %v1826_v45, %v909_v46  ;;  %v1743_v46 = vld [vmem:[%s2632_s6 + $0x28] sm:$0xff] }
 0x81c   :  { %v899_v54 = vmul.f32 %v1874_v34, %v898_v49 }
 0x81d   :  { %1751 = vmatmul.msk.f32.vlgmr.msrb.gmra.mxu2 %vm145_vm0, %v2412_v51 }
 0x81e   :  { %v903_v57 = vsel %vm902_vm7, %v1874_v34, %v899_v54 }
 0x81f   :  { %v905_v58 = vmul.f32 %v903_v57, %v871_v17 }
 0x821   :  { %v910_v59 = vmul.f32 %v1825_v38, %v905_v58 }
 0x823   :  { %v2416_v55 = vadd.f32 %v1826_v45, %v910_v59 }
 0x825   :  { %1752 = vmatmul.msk.f32.gmra.mxu2 %vm145_vm0, %v2416_v55 }
 0x8a0   :  { %v954_v61 = vpop.f32.mrf.mxu2 }
 0x8a1   :  { %v2423_v62 = vadd.f32 %v1827_v60, %v954_v61 }
 0x8a3   :  { %961 = vrot.lane.b32.xlu0 %v2423_v62, %s2051_s4 }
 0x8a8   :  { %v957_v56 = vpop.f32.mrf.mxu2 }
 0x8a9   :  { %v2427_v63 = vadd.f32 %v1827_v60, %v957_v56 }
 0x8ab   :  { %1146 = vrot.lane.b32.xlu0 %v2427_v63, %s2050_s29  ;;  %1148 = vrot.lane.b32.xlu1 %v2427_v63, %s2049_s28  ;;  %v1807_v36 = vpack.i.bf16 %v2427_v63, %v2423_v62 }
 0x8ac   :  { %988 = vrot.lane.b32.xlu2 %v2427_v63, %s2051_s4 }
 0x8b3   :  { %1118 = vrot.lane.b32.xlu1 %v2423_v62, %s2050_s29 }
 0x8b4   :  { %1120 = vrot.lane.b32.xlu2 %v2423_v62, %s2049_s28 }
 0x906   :  { %v989_v0 = vpop.permute.xlu2 %988 }
 0x907   :  { %1755 = vmatpush.xpose.msk.msrb.mxu3 %vm256_vm8, %v989_v0 }
 0x90a   :  { %1756 = vmatmul.msk.f32.vlgmr.msrb.gmra.mxu3 %vm256_vm8, %v2427_v63 }
 0x90e   :  { %v1121_v1 = vpop.permute.xlu2 %1120 }
 0x90f   :  { %1759 = vmatpush.xpose.msk.msra.mxu1 %vm256_vm8, %v1121_v1 }
 0x915   :  { %v962_v2 = vpop.permute.xlu0 %961 }
 0x916   :  { %1753 = vmatpush.xpose.msk.msrb.mxu0 %vm256_vm8, %v962_v2 }
 0x919   :  { %1754 = vmatmul.msk.f32.vlgmr.msrb.gmra.mxu0 %vm256_vm8, %v2423_v62 }
 0x91d   :  { %v1149_v43 = vpop.permute.xlu1 %1148  ;;  %v1147_v48 = vpop.permute.xlu0 %1146 }
 0x91e   :  { %1761 = vmatpush.xpose.msk.msra.mxu2 %vm256_vm8, %v1149_v43 }
 0x921   :  { %1762 = vmatmul.msk.f32.vlgmr.msra.gmra.mxu2 %vm256_vm8, %v1147_v48 }
 0x922   :  { %1327 = vmatpush.msrb.mxu2 %v1743_v46 }
 0x925   :  { %v1119_v44 = vpop.permute.xlu1 %1118 }
 0x926   :  { %1760 = vmatmul.msk.f32.vlgmr.msra.gmra.mxu1 %vm256_vm8, %v1119_v44 }
 0x98d   :  { %v1011_v3 = vpop.f32.mrf.mxu3 }
 0x98e   :  { %v1015_v4 = vmul.f32 0.25, %v1011_v3 }
 0x990   :  { %v1017_v6 = vadd.f32 %v1015_v4, %v2233_v5 }
 0x992   :  { %v1021_v7 = vsel %vm316_vm9, %v1017_v6, -inf }
 0x993   :  { %1022 = vmax.xlane.f32.xlu2 %v1021_v7 }
 0x996   :  { %v984_v53 = vpop.f32.mrf.mxu0 }
 0x997   :  { %v1014_v52 = vmul.f32 0.25, %v984_v53 }
 0x999   :  { %v1016_v9 = vadd.f32 %v1014_v52, %v2235_v8 }
 0x99b   :  { %v1018_v50 = vsel %vm316_vm9, %v1016_v9, -inf }
 0x99c   :  { %1019 = vmax.xlane.f32.xlu0 %v1018_v50 }
 0x9a3   :  { %v1143_v10 = vpop.f32.mrf.mxu1 }
 0x9a4   :  { %v1174_v12 = vmul.f32 0.25, %v1143_v10  ;;  %v1171_v13 = vpop.f32.mrf.mxu2 }
 0x9a5   :  { %v1175_v14 = vmul.f32 0.25, %v1171_v13 }
 0x9a6   :  { %v1176_v15 = vadd.f32 %v1174_v12, %v2235_v8 }
 0x9a7   :  { %v1177_v16 = vadd.f32 %v1175_v14, %v2233_v5 }
 0x9a8   :  { %v1178_v35 = vsel %vm316_vm9, %v1176_v15, -inf }
 0x9a9   :  { %1179 = vmax.xlane.f32.xlu1 %v1178_v35  ;;  %v1181_v17 = vsel %vm316_vm9, %v1177_v16, -inf }
 0x9aa   :  { %1182 = vmax.xlane.f32.xlu0 %v1181_v17 }
 0xa06   :  { %v1023_v18 = vpop.xlane.xlu2 %1022 }
 0xa07   :  { %v1025_v19 = vsub.f32 %v1017_v6, %v1023_v18 }
 0xa09   :  { %v1028_v41 = vmul.f32 1.442695, %v1025_v19 }
 0xa0b   :  { %1875 = vpow2.f32 %v1028_v41 }
 0xa0f   :  { %v1020_v20 = vpop.xlane.xlu0 %1019 }
 0xa10   :  { %v1024_v21 = vsub.f32 %v1016_v9, %v1020_v20 }
 0xa11   :  { %v2457_v22 = vpop.eup %1875 }
 0xa12   :  { %v1026_v23 = vmul.f32 1.442695, %v1024_v21  ;;  %v1033_v8 = vsel %vm316_vm9, %v2457_v22, 0.0 }
 0xa13   :  { %1034 = vadd.xlane.f32.xlu1 %v1033_v8 }
 0xa14   :  { %1877 = vpow2.f32 %v1026_v23 }
 0xa1a   :  { %v1878_v5 = vpop.eup %1877 }
 0xa1b   :  { %v1030_v24 = vsel %vm316_vm9, %v1878_v5, 0.0 }
 0xa1c   :  { %1031 = vadd.xlane.f32.xlu2 %v1030_v24  ;;  %v1180_v25 = vpop.xlane.xlu1 %1179 }
 0xa1d   :  { %v1184_v26 = vsub.f32 %v1176_v15, %v1180_v25  ;;  %v1183_v27 = vpop.xlane.xlu0 %1182 }
 0xa1e   :  { %v1185_v28 = vsub.f32 %v1177_v16, %v1183_v27 }
 0xa1f   :  { %v1186_v29 = vmul.f32 1.442695, %v1184_v26 }
 0xa20   :  { %v1188_v30 = vmul.f32 1.442695, %v1185_v28 }
 0xa21   :  { %1879 = vpow2.f32 %v1186_v29 }
 0xa22   :  { %1881 = vpow2.f32 %v1188_v30  ;;  %v1742_v30 = vld [vmem:[%s2632_s6 + $0x20] sm:$0xff] }
 0xa23   :  { %1328 = vmatpush.msrb.mxu2 %v1742_v30 }
 0xa27   :  { %v2462_v31 = vpop.eup %1879 }
 0xa28   :  { %v2464_v32 = vpop.eup %1881  ;;  %v1190_v33 = vsel %vm316_vm9, %v2462_v31, 0.0 }
 0xa29   :  { %1191 = vadd.xlane.f32.xlu0 %v1190_v33  ;;  %v1193_v34 = vsel %vm316_vm9, %v2464_v32, 0.0  ;;  %v1745_v33 = vld [vmem:[%s2632_s6 + $0x38] sm:$0xff] }
 0xa2a   :  { %1194 = vadd.xlane.f32.xlu2 %v1193_v34  ;;  %1298 = vmatpush.msrb.mxu1 %v1745_v33 }
 0xa2c   :  { %1808 = vrot.lane.b32.xlu1 %v1807_v36, %s2052_s19  ;;  %s2664_s19 = sld [smem:[#allocation19_spill]] }
 0xa3d   :  { %1813 = vrot.lane.b32.xlu0 %v1807_v36, %s2053_s21 }
 0xa86   :  { %v1035_v38 = vpop.xlane.xlu1 %1034 }
 0xa87   :  { %1883 = vrcp.f32 %v1035_v38  ;;  %v1062_v57 = vand.u32 2147483648, %v1035_v38  ;;  %vm1056_vm11 = vweird.f32 %v1035_v38  ;;  %v1060_v58 = vand.u32 2147483647, %v1035_v38 }
 0xa89   :  { %v1063_v63 = vor.u32 1.1754944e-38, %v1062_v57  ;;  %vm1061_vm14 = vcmp.eq.f32.partialorder %v1060_v58, 8.507059e+37 }
 0xa8d   :  { %v1884_v39 = vpop.eup %1883 }
 0xa8e   :  { %v1052_v40 = vmul.f32 %v1884_v39, %v1035_v38  ;;  %vm1057_vm10 = vweird.f32 %v1884_v39 }
 0xa8f   :  { %v1032_v42 = vpop.xlane.xlu2 %1031  ;;  %vm1058_vm12 = vmor %vm1056_vm11, %vm1057_vm10 }
 0xa90   :  { %1885 = vrcp.f32 %v1032_v42  ;;  %v1053_v37 = vsub.f32 1.0, %v1052_v40  ;;  %v1047_v60 = vand.u32 2147483648, %v1032_v42  ;;  %v1045_v56 = vand.u32 2147483647, %v1032_v42  ;;  %v1828_v40 = vld [vmem:[%s2633_s7 + $0x1] ss:$0 sm:$0xff] }
 0xa91   :  { %vm1041_vm1 = vweird.f32 %v1032_v42 }
 0xa92   :  { %v1054_v45 = vmul.f32 %v1884_v39, %v1053_v37  ;;  %v1048_v43 = vor.u32 1.1754944e-38, %v1047_v60  ;;  %vm1046_vm3 = vcmp.eq.f32.partialorder %v1045_v56, 8.507059e+37 }
 0xa94   :  { %v1055_v49 = vadd.f32 %v1884_v39, %v1054_v45 }
 0xa96   :  { %v1886_v47 = vpop.eup %1885  ;;  %v1059_v61 = vsel %vm1058_vm12, %v1884_v39, %v1055_v49 }
 0xa97   :  { %v1037_v54 = vmul.f32 %v1886_v47, %v1032_v42  ;;  %vm1042_vm13 = vweird.f32 %v1886_v47  ;;  %v1064_v2 = vsel %vm1061_vm14, %v1063_v63, %v1059_v61 }
 0xa98   :  { %vm1043_vm2 = vmor %vm1041_vm1, %vm1042_vm13  ;;  %v1065_v53 = vmul.f32 %v2457_v22, %v1064_v2 }
 0xa99   :  { %v1038_v59 = vsub.f32 1.0, %v1037_v54 }
 0xa9b   :  { %v1039_v62 = vmul.f32 %v1886_v47, %v1038_v59 }
 0xa9c   :  { %v1192_v1 = vpop.xlane.xlu0 %1191 }
 0xa9d   :  { %v1040_v0 = vadd.f32 %v1886_v47, %v1039_v62  ;;  %1887 = vrcp.f32 %v1192_v1  ;;  %v1195_v48 = vpop.xlane.xlu2 %1194  ;;  %v1207_v16 = vand.u32 2147483648, %v1192_v1  ;;  %v1205_v17 = vand.u32 2147483647, %v1192_v1 }
 0xa9e   :  { %v1809_v3 = vpop.permute.xlu1 %1808  ;;  %1889 = vrcp.f32 %v1195_v48  ;;  %v1222_v35 = vand.u32 2147483648, %v1195_v48  ;;  %v1220_v19 = vand.u32 2147483647, %v1195_v48  ;;  %vm1201_vm6 = vweird.f32 %v1192_v1 }
 0xa9f   :  { %v1044_v44 = vsel %vm1043_vm2, %v1886_v47, %v1040_v0  ;;  %v1811_v6 = vunpack.i.h.bf16 %v1809_v3  ;;  %v1810_v7 = vunpack.i.l.bf16 %v1809_v3  ;;  %vm1216_vm10 = vweird.f32 %v1195_v48  ;;  %v1772_v3 = vld [vmem:[%s2636_s10 + $0x28] sm:$0xff] }
 0xaa0   :  { %v1049_v4 = vsel %vm1046_vm3, %v1048_v43, %v1044_v44  ;;  %v1208_v22 = vor.u32 1.1754944e-38, %v1207_v16  ;;  %v1223_v23 = vor.u32 1.1754944e-38, %v1222_v35  ;;  %vm1206_vm12 = vcmp.eq.f32.partialorder %v1205_v17, 8.507059e+37  ;;  %v1773_v44 = vld [vmem:[%s2636_s10 + $0x30] sm:$0xff] }
 0xaa1   :  { %v1050_v52 = vmul.f32 %v1878_v5, %v1049_v4  ;;  %1113 = vmatpush.msra.mxu3 %v1811_v6  ;;  %1087 = vmatpush.msra.mxu0 %v1810_v7  ;;  %vm1221_vm13 = vcmp.eq.f32.partialorder %v1220_v19, 8.507059e+37  ;;  %v1771_v4 = vld [vmem:[%s2636_s10 + $0x20] sm:$0xff] }
 0xaa2   :  { %1758 = vmatmul.msk.f32.vlgmr.msra.gmra.mxu3 %vm316_vm9, %v1065_v53 }
 0xaa3   :  { %v1888_v9 = vpop.eup %1887  ;;  %1757 = vmatmul.msk.f32.vlgmr.msra.gmra.mxu0 %vm316_vm9, %v1050_v52 }
 0xaa4   :  { %v1890_v50 = vpop.eup %1889  ;;  %v1197_v10 = vmul.f32 %v1888_v9, %v1192_v1  ;;  %vm1202_vm4 = vweird.f32 %v1888_v9 }
 0xaa5   :  { %v1212_v12 = vmul.f32 %v1890_v50, %v1195_v48  ;;  %vm1217_vm5 = vweird.f32 %v1890_v50  ;;  %vm1203_vm7 = vmor %vm1201_vm6, %vm1202_vm4 }
 0xaa6   :  { %v1198_v13 = vsub.f32 1.0, %v1197_v10  ;;  %vm1218_vm11 = vmor %vm1216_vm10, %vm1217_vm5 }
 0xaa7   :  { %v1213_v14 = vsub.f32 1.0, %v1212_v12 }
 0xaa8   :  { %v1199_v15 = vmul.f32 %v1888_v9, %v1198_v13 }
 0xaa9   :  { %v1214_v18 = vmul.f32 %v1890_v50, %v1213_v14 }
 0xaaa   :  { %v1200_v41 = vadd.f32 %v1888_v9, %v1199_v15 }
 0xaab   :  { %v1215_v20 = vadd.f32 %v1890_v50, %v1214_v18  ;;  %v1829_v18 = vld [vmem:[%s2634_s8 + $0x1] ss:$0 sm:$0xff] }
 0xaac   :  { %v1204_v21 = vsel %vm1203_vm7, %v1888_v9, %v1200_v41 }
 0xaad   :  { %v1219_v8 = vsel %vm1218_vm11, %v1890_v50, %v1215_v20  ;;  %v1209_v5 = vsel %vm1206_vm12, %v1208_v22, %v1204_v21  ;;  %v1830_v21 = vld [vmem:[#allocation8 + $0x1] ss:$0 sm:$0xff] }
 0xaae   :  { %v1224_v24 = vsel %vm1221_vm13, %v1223_v23, %v1219_v8  ;;  %v1210_v28 = vmul.f32 %v2462_v31, %v1209_v5  ;;  %v1744_v31 = vld [vmem:[%s2632_s6 + $0x30] sm:$0xff] }
 0xaaf   :  { %v1814_v25 = vpop.permute.xlu0 %1813  ;;  %v1225_v29 = vmul.f32 %v2464_v32, %v1224_v24  ;;  %1299 = vmatpush.msrb.mxu1 %v1744_v31 }
 0xab0   :  { %v1816_v26 = vunpack.i.h.bf16 %v1814_v25  ;;  %v1815_v27 = vunpack.i.l.bf16 %v1814_v25 }
 0xab2   :  { %1247 = vmatpush.msrb.mxu0 %v1815_v27  ;;  %1273 = vmatpush.msrb.mxu3 %v1816_v26 }
 0xab3   :  { %1763 = vmatmul.msk.f32.vlgmr.msrb.gmra.mxu0 %vm316_vm9, %v1210_v28  ;;  %1764 = vmatmul.msk.f32.vlgmr.msrb.gmra.mxu3 %vm316_vm9, %v1225_v29  ;;  %v1831_v29 = vld [vmem:[%s2637_s11 + $0x1] ss:$0 sm:$0xff] }
 0xb20   :  { %v1089_v32 = vpop.f32.mrf.mxu0 }
 0xb21   :  { %1767 = vmatmul.msk.f32.vlgmr.msrb.gmra.mxu2 %vm256_vm8, %v1089_v32 }
 0xb25   :  { %v1115_v34 = vpop.f32.mrf.mxu3 }
 0xb29   :  { %1768 = vmatmul.msk.f32.gmra.mxu2 %vm256_vm8, %v1115_v34 }
 0xb30   :  { %v1249_v36 = vpop.f32.mrf.mxu0 }
 0xb31   :  { %1765 = vmatmul.msk.f32.vlgmr.msrb.gmra.mxu1 %vm256_vm8, %v1249_v36 }
 0xb36   :  { %v1275_v38 = vpop.f32.mrf.mxu3 }
 0xb39   :  { %1766 = vmatmul.msk.f32.gmra.mxu1 %vm256_vm8, %v1275_v38 }
 0xba4   :  { %v1330_v39 = vpop.f32.mrf.mxu2 }
 0xbac   :  { %v1333_v49 = vpop.f32.mrf.mxu2 }
 0xbae   :  { %v1301_v42 = vpop.f32.mrf.mxu1 }
 0xbaf   :  { %v1331_v37 = vadd.f32 %v1330_v39, %v1301_v42 }
 0xbb1   :  { %v1341_v45 = vadd.f32 %v1828_v40, %v1331_v37  ;;  %v1784_v37 = vld [vmem:[%s2638_s12 + $0x70] sm:$0xff] }
 0xbb3   :  { %v1343_v46 = vadd.f32 %v1341_v45, %v2412_v51 }
 0xbb5   :  { %v1349_v47 = vsel %vm145_vm0, %v1343_v46, 0.0 }
 0xbb6   :  { %1350 = vadd.xlane.f32.xlu2 %v1349_v47  ;;  %v1304_v54 = vpop.f32.mrf.mxu1 }
 0xbb7   :  { %v1334_v57 = vadd.f32 %v1333_v49, %v1304_v54  ;;  %v1782_v54 = vld [vmem:[%s2638_s12 + $0x60] sm:$0xff] }
 0xbb9   :  { %v1342_v58 = vadd.f32 %v1828_v40, %v1334_v57  ;;  %v1785_v40 = vld [vmem:[%s2638_s12 + $0x78] sm:$0xff] }
 0xbba   :  { %1550 = vmatpush.msra.mxu3 %v1785_v40 }
 0xbbb   :  { %v1344_v59 = vadd.f32 %v1342_v58, %v2416_v55  ;;  %v1774_v55 = vld [vmem:[%s2636_s10 + $0x38] sm:$0xff] }
 0xbbc   :  { %1431 = vmatpush.msra.mxu0 %v1774_v55  ;;  %1551 = vmatpush.msra.mxu3 %v1784_v37 }
 0xbbd   :  { %v1352_v60 = vsel %vm145_vm0, %v1344_v59, 0.0 }
 0xbbe   :  { %1353 = vadd.xlane.f32.xlu2 %v1352_v60  ;;  %1432 = vmatpush.msra.mxu0 %v1773_v44 }
 0xbc0   :  { %1433 = vmatpush.msra.mxu0 %v1772_v3 }
 0xbc2   :  { %1434 = vmatpush.msra.mxu0 %v1771_v4 }
 0xc29   :  { %v1351_v61 = vpop.xlane.xlu2 %1350 }
 0xc2a   :  { %v1355_v62 = vmul.f32 %v1351_v61, %v2179_v11 }
 0xc2c   :  { %v1357_v56 = vsub.f32 %v1343_v46, %v1355_v62  ;;  %v1783_v46 = vld [vmem:[%s2638_s12 + $0x68] sm:$0xff]  ;;  %v1780_v62 = vld [vmem:[%s2638_s12 + $0x50] sm:$0xff] }
 0xc2d   :  { %1552 = vmatpush.msra.mxu3 %v1783_v46 }
 0xc2e   :  { %v1359_v63 = vmul.f32 %v1357_v56, %v1357_v56 }
 0xc2f   :  { %1553 = vmatpush.msra.mxu3 %v1782_v54 }
 0xc30   :  { %v1361_v0 = vsel %vm145_vm0, %v1359_v63, 0.0 }
 0xc31   :  { %1362 = vadd.xlane.f32.xlu2 %v1361_v0  ;;  %v1354_v51 = vpop.xlane.xlu2 %1353  ;;  %v1779_v0 = vld [vmem:[%s2638_s12 + $0x48] sm:$0xff] }
 0xc32   :  { %v1356_v1 = vmul.f32 %v1354_v51, %v2179_v11  ;;  %v1778_v51 = vld [vmem:[%s2638_s12 + $0x40] sm:$0xff] }
 0xc34   :  { %v1358_v2 = vsub.f32 %v1344_v59, %v1356_v1  ;;  %v1781_v59 = vld [vmem:[%s2638_s12 + $0x58] sm:$0xff] }
 0xc35   :  { %1554 = vmatpush.msra.mxu3 %v1781_v59 }
 0xc36   :  { %v1360_v43 = vmul.f32 %v1358_v2, %v1358_v2 }
 0xc37   :  { %1555 = vmatpush.msra.mxu3 %v1780_v62 }
 0xc38   :  { %v1364_v48 = vsel %vm145_vm0, %v1360_v43, 0.0 }
 0xc39   :  { %1365 = vadd.xlane.f32.xlu0 %v1364_v48  ;;  %1556 = vmatpush.msra.mxu3 %v1779_v0 }
 0xc3b   :  { %1557 = vmatpush.msra.mxu3 %v1778_v51 }
 0xca4   :  { %v1363_v6 = vpop.xlane.xlu2 %1362 }
 0xca5   :  { %v1367_v7 = vmul.f32 %v1363_v6, %v2179_v11 }
 0xca7   :  { %v1369_v53 = vadd.f32 1e-12, %v1367_v7 }
 0xca9   :  { %1891 = vrsqrt.f32 %v1369_v53  ;;  %vm1377_vm9 = vweird.f32 %v1369_v53 }
 0xcac   :  { %v1366_v52 = vpop.xlane.xlu0 %1365 }
 0xcad   :  { %v1368_v9 = vmul.f32 %v1366_v52, %v2179_v11 }
 0xcaf   :  { %v1892_v50 = vpop.eup %1891  ;;  %v1370_v10 = vadd.f32 1e-12, %v1368_v9 }
 0xcb0   :  { %v1372_v12 = vmul.f32 %v1892_v50, %v1369_v53  ;;  %vm1378_vm8 = vweird.f32 %v1892_v50 }
 0xcb1   :  { %1893 = vrsqrt.f32 %v1370_v10  ;;  %vm1379_vm14 = vmor %vm1377_vm9, %vm1378_vm8  ;;  %vm1387_vm2 = vweird.f32 %v1370_v10 }
 0xcb2   :  { %v1373_v13 = vmul.f32 %v1892_v50, %v1372_v12 }
 0xcb4   :  { %v1374_v14 = vmul.f32 0.5, %v1373_v13 }
 0xcb6   :  { %v1375_v15 = vsub.f32 1.5, %v1374_v14 }
 0xcb7   :  { %v1894_v16 = vpop.eup %1893 }
 0xcb8   :  { %v1376_v35 = vmul.f32 %v1892_v50, %v1375_v15  ;;  %v1382_v17 = vmul.f32 %v1894_v16, %v1370_v10  ;;  %vm1388_vm1 = vweird.f32 %v1894_v16 }
 0xcb9   :  { %vm1389_vm3 = vmor %vm1387_vm2, %vm1388_vm1 }
 0xcba   :  { %v1380_v19 = vsel %vm1379_vm14, %v1892_v50, %v1376_v35  ;;  %v1383_v41 = vmul.f32 %v1894_v16, %v1382_v17 }
 0xcbb   :  { %v1391_v20 = vmul.f32 %v1380_v19, %v1357_v56 }
 0xcbc   :  { %v1384_v22 = vmul.f32 0.5, %v1383_v41 }
 0xcbd   :  { %v1396_v23 = vmul.f32 %v1829_v18, %v1391_v20 }
 0xcbe   :  { %v1385_v8 = vsub.f32 1.5, %v1384_v22 }
 0xcbf   :  { %v2525_v5 = vadd.f32 %v1830_v21, %v1396_v23 }
 0xcc0   :  { %v1386_v24 = vmul.f32 %v1894_v16, %v1385_v8 }
 0xcc1   :  { %1776 = vmatmul.msk.f32.vlgmr.msra.gmra.mxu0 %vm145_vm0, %v2525_v5 }
 0xcc2   :  { %v1390_v25 = vsel %vm1389_vm3, %v1894_v16, %v1386_v24 }
 0xcc3   :  { %v1392_v26 = vmul.f32 %v1390_v25, %v1358_v2 }
 0xcc5   :  { %v1397_v27 = vmul.f32 %v1829_v18, %v1392_v26 }
 0xcc7   :  { %v2529_v28 = vadd.f32 %v1830_v21, %v1397_v27 }
 0xcc9   :  { %1777 = vmatmul.msk.f32.gmra.mxu0 %vm145_vm0, %v2529_v28 }
 0xd3e   :  { %v1436_v30 = vpop.f32.mrf.mxu0 }
 0xd3f   :  { %v2536_v33 = vadd.f32 %v1831_v29, %v1436_v30 }
 0xd41   :  { %v2539_v31 = vmul.f32 0.70710677, %v2536_v33  ;;  %v1442_v46 = vmul.f32 0.5, %v2536_v33  ;;  %v1832_v33 = vld [vmem:[%s2639_s13 + $0x1] ss:$0 sm:$0xff] }
 0xd43   :  { %v1446_v32 = vand.u32 2147483647, %v2539_v31  ;;  %vm1512_vm8 = vcmp.ge.f32.partialorder %v2539_v31, 0.0 }
 0xd45   :  { %v1448_v34 = vmul.f32 0.3275911, %v1446_v32  ;;  %v1500_v44 = vsub.f32 0.0, %v1446_v32 }
 0xd46   :  { %v1439_v36 = vpop.f32.mrf.mxu0 }
 0xd47   :  { %v1450_v38 = vadd.f32 1.0, %v1448_v34  ;;  %v2542_v39 = vadd.f32 %v1831_v29, %v1439_v36  ;;  %v1502_v52 = vmul.f32 %v1500_v44, %v1446_v32 }
 0xd49   :  { %1895 = vrcp.f32 %v1450_v38  ;;  %v2548_v42 = vmul.f32 0.70710677, %v2542_v39  ;;  %v1463_v61 = vand.u32 2147483648, %v1450_v38  ;;  %v1461_v63 = vand.u32 2147483647, %v1450_v38 }
 0xd4a   :  { %vm1457_vm5 = vweird.f32 %v1450_v38  ;;  %v1504_v15 = vmul.f32 1.442695, %v1502_v52 }
 0xd4b   :  { %v1447_v45 = vand.u32 2147483647, %v2548_v42  ;;  %v1464_v2 = vor.u32 1.1754944e-38, %v1463_v61  ;;  %vm1462_vm7 = vcmp.eq.f32.partialorder %v1461_v63, 8.507059e+37  ;;  %vm1513_vm9 = vcmp.ge.f32.partialorder %v2548_v42, 0.0 }
 0xd4c   :  { %v1443_v61 = vmul.f32 0.5, %v2542_v39 }
 0xd4d   :  { %v1449_v47 = vmul.f32 0.3275911, %v1447_v45  ;;  %v1501_v17 = vsub.f32 0.0, %v1447_v45 }
 0xd4f   :  { %v1896_v49 = vpop.eup %1895  ;;  %v1451_v58 = vadd.f32 1.0, %v1449_v47  ;;  %v1503_v22 = vmul.f32 %v1501_v17, %v1447_v45 }
 0xd50   :  { %v1453_v57 = vmul.f32 %v1896_v49, %v1450_v38  ;;  %vm1458_vm4 = vweird.f32 %v1896_v49 }
 0xd51   :  { %1897 = vrcp.f32 %v1451_v58  ;;  %vm1459_vm6 = vmor %vm1457_vm5, %vm1458_vm4  ;;  %v1478_v53 = vand.u32 2147483648, %v1451_v58  ;;  %v1476_v50 = vand.u32 2147483647, %v1451_v58  ;;  %vm1472_vm11 = vweird.f32 %v1451_v58 }
 0xd52   :  { %v1454_v60 = vsub.f32 1.0, %v1453_v57  ;;  %1899 = vpow2.f32 %v1504_v15  ;;  %v1506_v26 = vmul.f32 1.442695, %v1503_v22  ;;  %vm1636_vm5 = vcmask 1041409  }
 0xd53   :  { %v1479_v14 = vor.u32 1.1754944e-38, %v1478_v53  ;;  %vm1477_vm13 = vcmp.eq.f32.partialorder %v1476_v50, 8.507059e+37  ;;  %v1627_v50 = vld [vmem:[%s2642_s16 + $0x10] sm:$0xff] }
 0xd54   :  { %v1455_v56 = vmul.f32 %v1896_v49, %v1454_v60  ;;  %1901 = vpow2.f32 %v1506_v26 }
 0xd56   :  { %v1456_v1 = vadd.f32 %v1896_v49, %v1455_v56 }
 0xd57   :  { %v1898_v43 = vpop.eup %1897 }
 0xd58   :  { %v1460_v48 = vsel %vm1459_vm6, %v1896_v49, %v1456_v1  ;;  %v1468_v3 = vmul.f32 %v1898_v43, %v1451_v58  ;;  %vm1473_vm10 = vweird.f32 %v1898_v43  ;;  %v1900_v27 = vpop.eup %1899 }
 0xd59   :  { %v1465_v55 = vsel %vm1462_vm7, %v1464_v2, %v1460_v48  ;;  %vm1474_vm12 = vmor %vm1472_vm11, %vm1473_vm10 }
 0xd5a   :  { %v1482_v4 = vmul.f32 1.0614054, %v1465_v55  ;;  %v1469_v6 = vsub.f32 1.0, %v1468_v3  ;;  %v1902_v49 = vpop.eup %1901 }
 0xd5c   :  { %v1484_v7 = vadd.f32 -1.4531521, %v1482_v4  ;;  %v1470_v9 = vmul.f32 %v1898_v43, %v1469_v6 }
 0xd5e   :  { %v1486_v10 = vmul.f32 %v1484_v7, %v1465_v55  ;;  %v1471_v12 = vadd.f32 %v1898_v43, %v1470_v9 }
 0xd60   :  { %v1488_v13 = vadd.f32 1.4214138, %v1486_v10  ;;  %v1475_v16 = vsel %vm1474_vm12, %v1898_v43, %v1471_v12  ;;  %v1626_v10 = vld [vmem:[%s2642_s16 + $0x8] sm:$0xff] }
 0xd61   :  { %v1480_v18 = vsel %vm1477_vm13, %v1479_v14, %v1475_v16 }
 0xd62   :  { %v1490_v35 = vmul.f32 %v1488_v13, %v1465_v55  ;;  %v1483_v19 = vmul.f32 1.0614054, %v1480_v18  ;;  %v1625_v13 = vld [vmem:[%s2642_s16] sm:$0xff] }
 0xd64   :  { %v1492_v41 = vadd.f32 -0.28449672, %v1490_v35  ;;  %v1485_v20 = vadd.f32 -1.4531521, %v1483_v19 }
 0xd66   :  { %v1494_v21 = vmul.f32 %v1492_v41, %v1465_v55  ;;  %v1487_v23 = vmul.f32 %v1485_v20, %v1480_v18 }
 0xd68   :  { %v1496_v8 = vadd.f32 0.2548296, %v1494_v21  ;;  %v1489_v24 = vadd.f32 1.4214138, %v1487_v23 }
 0xd6a   :  { %v1498_v25 = vmul.f32 %v1496_v8, %v1465_v55  ;;  %v1491_v29 = vmul.f32 %v1489_v24, %v1480_v18  ;;  %v1833_v24 = vld [vmem:[%s2640_s14 + $0x1] ss:$0 sm:$0xff] }
 0xd6c   :  { %v1508_v30 = vmul.f32 %v1900_v27, %v1498_v25  ;;  %v1493_v32 = vadd.f32 -0.28449672, %v1491_v29  ;;  %v1834_v29 = vld [vmem:[#allocation10 + $0x1] ss:$0 sm:$0xff] }
 0xd6e   :  { %v1510_v34 = vsub.f32 1.0, %v1508_v30  ;;  %v1495_v36 = vmul.f32 %v1493_v32, %v1480_v18 }
 0xd70   :  { %v1514_v38 = vsub.f32 0.0, %v1510_v34  ;;  %v1497_v40 = vadd.f32 0.2548296, %v1495_v36 }
 0xd72   :  { %v1516_v37 = vsel %vm1512_vm8, %v1510_v34, %v1514_v38  ;;  %v1499_v47 = vmul.f32 %v1497_v40, %v1480_v18 }
 0xd73   :  { %v1518_v45 = vadd.f32 1.0, %v1516_v37 }
 0xd74   :  { %v1509_v57 = vmul.f32 %v1902_v49, %v1499_v47  ;;  %v1663_v47 = vld [vmem:[%s2644_s18 + $0x10] sm:$0xff]  ;;  %v1662_v49 = vld [vmem:[%s2644_s18 + $0x8] sm:$0xff] }
 0xd75   :  { %v1520_v54 = vmul.f32 %v1518_v45, %v1442_v46  ;;  %v1664_v45 = vld [vmem:[%s2644_s18 + $0x18] sm:$0xff] }
 0xd76   :  { %v1511_v58 = vsub.f32 1.0, %v1509_v57  ;;  %1684 = vmatpush.msra.mxu2 %v1664_v45  ;;  %v1835_v57 = vld [vmem:[%s2664_s19] ss:$0 sm:$0xff] }
 0xd77   :  { %1787 = vmatmul.msk.f32.vlgmr.msra.gmra.mxu3 %vm828_vm15, %v1520_v54  ;;  %v1661_v54 = vld [vmem:[%s2644_s18] sm:$0xff] }
 0xd78   :  { %v1515_v59 = vsub.f32 0.0, %v1511_v58  ;;  %1685 = vmatpush.msra.mxu2 %v1663_v47 }
 0xd7a   :  { %v1517_v60 = vsel %vm1513_vm9, %v1511_v58, %v1515_v59  ;;  %1686 = vmatpush.msra.mxu2 %v1662_v49 }
 0xd7b   :  { %v1519_v62 = vadd.f32 1.0, %v1517_v60 }
 0xd7c   :  { %1687 = vmatpush.msra.mxu2 %v1661_v54 }
 0xd7d   :  { %v1521_v31 = vmul.f32 %v1519_v62, %v1443_v61  ;;  %v1836_v61 = vld [vmem:[#allocation2] ss:$0 sm:$0xff] }
 0xd7f   :  { %1788 = vmatmul.msk.f32.gmra.mxu3 %vm828_vm15, %v1521_v31 }
 0xdfa   :  { %v1559_v56 = vpop.f32.mrf.mxu3 }
 0xdfb   :  { %v1560_v63 = vadd.f32 %v1832_v33, %v1559_v56 }
 0xdfd   :  { %v1565_v0 = vadd.f32 %v1560_v63, %v2525_v5 }
 0xdff   :  { %v1571_v51 = vsel %vm145_vm0, %v1565_v0, 0.0 }
 0xe00   :  { %1572 = vadd.xlane.f32.xlu2 %v1571_v51 }
 0xe02   :  { %v1562_v1 = vpop.f32.mrf.mxu3 }
 0xe03   :  { %v1563_v42 = vadd.f32 %v1832_v33, %v1562_v1 }
 0xe05   :  { %v1566_v2 = vadd.f32 %v1563_v42, %v2529_v28  ;;  %v1628_v28 = vld [vmem:[%s2642_s16 + $0x18] sm:$0xff] }
 0xe06   :  { %1652 = vmatpush.msra.mxu1 %v1628_v28 }
 0xe07   :  { %v1574_v39 = vsel %vm145_vm0, %v1566_v2, 0.0 }
 0xe08   :  { %1575 = vadd.xlane.f32.xlu1 %v1574_v39  ;;  %1653 = vmatpush.msra.mxu1 %v1627_v50 }
 0xe0a   :  { %1654 = vmatpush.msra.mxu1 %v1626_v10 }
 0xe0c   :  { %1655 = vmatpush.msra.mxu1 %v1625_v13 }
 0xe73   :  { %v1573_v43 = vpop.xlane.xlu2 %1572 }
 0xe74   :  { %v1577_v44 = vmul.f32 %v1573_v43, %v2179_v11 }
 0xe76   :  { %v1579_v6 = vsub.f32 %v1565_v0, %v1577_v44 }
 0xe78   :  { %v1581_v7 = vmul.f32 %v1579_v6, %v1579_v6 }
 0xe7a   :  { %v1583_v53 = vsel %vm145_vm0, %v1581_v7, 0.0 }
 0xe7b   :  { %v1576_v48 = vpop.xlane.xlu1 %1575 }
 0xe7c   :  { %v1578_v55 = vmul.f32 %v1576_v48, %v2179_v11 }
 0xe7e   :  { %v1580_v3 = vsub.f32 %v1566_v2, %v1578_v55 }
 0xe80   :  { %v1582_v4 = vmul.f32 %v1580_v3, %v1580_v3 }
 0xe82   :  { %v1586_v5 = vsel %vm145_vm0, %v1582_v4, 0.0 }
 0xe83   :  { %1587 = vadd.xlane.f32.xlu2 %v1586_v5 }
 0xe8b   :  { %1584 = vadd.xlane.f32.xlu2 %v1583_v53 }
 0xef6   :  { %v1588_v52 = vpop.xlane.xlu2 %1587 }
 0xef7   :  { %v1590_v9 = vmul.f32 %v1588_v52, %v2179_v11 }
 0xef9   :  { %v1592_v12 = vadd.f32 1e-12, %v1590_v9 }
 0xefb   :  { %1903 = vrsqrt.f32 %v1592_v12  ;;  %vm1609_vm14 = vweird.f32 %v1592_v12 }
 0xefe   :  { %v1585_v14 = vpop.xlane.xlu2 %1584 }
 0xeff   :  { %v1589_v15 = vmul.f32 %v1585_v14, %v2179_v11 }
 0xf01   :  { %v1904_v16 = vpop.eup %1903  ;;  %v1591_v35 = vadd.f32 1e-12, %v1589_v15 }
 0xf02   :  { %v1604_v17 = vmul.f32 %v1904_v16, %v1592_v12  ;;  %vm1610_vm15 = vweird.f32 %v1904_v16 }
 0xf03   :  { %1905 = vrsqrt.f32 %v1591_v35  ;;  %vm1611_vm1 = vmor %vm1609_vm14, %vm1610_vm15  ;;  %vm1599_vm3 = vweird.f32 %v1591_v35 }
 0xf04   :  { %v1605_v18 = vmul.f32 %v1904_v16, %v1604_v17 }
 0xf06   :  { %v1606_v19 = vmul.f32 0.5, %v1605_v18 }
 0xf08   :  { %v1607_v41 = vsub.f32 1.5, %v1606_v19 }
 0xf09   :  { %v1906_v20 = vpop.eup %1905 }
 0xf0a   :  { %v1608_v21 = vmul.f32 %v1904_v16, %v1607_v41  ;;  %v1594_v22 = vmul.f32 %v1906_v20, %v1591_v35  ;;  %vm1600_vm2 = vweird.f32 %v1906_v20 }
 0xf0b   :  { %vm1601_vm4 = vmor %vm1599_vm3, %vm1600_vm2 }
 0xf0c   :  { %v1612_v23 = vsel %vm1611_vm1, %v1904_v16, %v1608_v21  ;;  %v1595_v8 = vmul.f32 %v1906_v20, %v1594_v22 }
 0xf0d   :  { %v1614_v11 = vmul.f32 %v1612_v23, %v1580_v3 }
 0xf0e   :  { %v1596_v25 = vmul.f32 0.5, %v1595_v8 }
 0xf0f   :  { %v1619_v27 = vmul.f32 %v1833_v24, %v1614_v11 }
 0xf10   :  { %v1597_v26 = vsub.f32 1.5, %v1596_v25 }
 0xf11   :  { %v1624_v36 = vadd.f32 %v1834_v29, %v1619_v27 }
 0xf12   :  { %v1598_v30 = vmul.f32 %v1906_v20, %v1597_v26 }
 0xf13   :  { %v1635_v37 = vrot.slane %v1624_v36, 7 }
 0xf14   :  { %v1602_v32 = vsel %vm1601_vm4, %v1906_v20, %v1598_v30 }
 0xf15   :  { %v1613_v34 = vmul.f32 %v1602_v32, %v1579_v6 }
 0xf17   :  { %v1618_v38 = vmul.f32 %v1833_v24, %v1613_v34 }
 0xf19   :  { %v1623_v40 = vadd.f32 %v1834_v29, %v1618_v38 }
 0xf1b   :  { %v1637_v46 = vsel %vm1636_vm5, %v1635_v37, %v1623_v40 }
 0xf1c   :  { %1790 = vmatmul.msk.f32.vlgmr.msra.gmra.mxu1 %vm145_vm0, %v1637_v46 }
 0xf99   :  { %v1657_v58 = vpop.f32.mrf.mxu1 }
 0xf9a   :  { %v1658_v59 = vadd.f32 %v1835_v57, %v1657_v58 }
 0xf9c   :  { %1907 = vtanh.f32 %v1658_v59 }
 0xfa2   :  { %v1908_v60 = vpop.eup %1907 }
 0xfa3   :  { %1791 = vmatmul.msk.f32.vlgmr.msra.gmra.mxu2 %vm145_vm0, %v1908_v60  ;;  %vm1711_vm0 = vcmask 1024  }
0x1026   :  { %v1689_v62 = vpop.f32.mrf.mxu2 }
0x1027   :  { %v1690_v31 = vadd.f32 %v1836_v61, %v1689_v62 }
0x1029   :  { %v1692_v33 = vsub.f32 0.0, %v1690_v31 }
0x102b   :  { %v1693_v56 = vmul.f32 1.442695, %v1692_v33 }
0x102d   :  { %1909 = vpow2.f32 %v1693_v56 }
0x1033   :  { %v1910_v63 = vpop.eup %1909 }
0x1034   :  { %v1695_v0 = vadd.f32 1.0, %v1910_v63 }
0x1036   :  { %1911 = vrcp.f32 %v1695_v0  ;;  %v1707_v2 = vand.u32 2147483648, %v1695_v0  ;;  %v1705_v43 = vand.u32 2147483647, %v1695_v0  ;;  %vm1701_vm7 = vweird.f32 %v1695_v0 }
0x1038   :  { %v1708_v55 = vor.u32 1.1754944e-38, %v1707_v2  ;;  %vm1706_vm11 = vcmp.eq.f32.partialorder %v1705_v43, 8.507059e+37 }
0x103c   :  { %v1912_v51 = vpop.eup %1911 }
0x103d   :  { %v1697_v1 = vmul.f32 %v1912_v51, %v1695_v0  ;;  %vm1702_vm6 = vweird.f32 %v1912_v51 }
0x103e   :  { %vm1703_vm10 = vmor %vm1701_vm7, %vm1702_vm6 }
0x103f   :  { %v1698_v42 = vsub.f32 1.0, %v1697_v1 }
0x1041   :  { %v1699_v39 = vmul.f32 %v1912_v51, %v1698_v42 }
0x1043   :  { %v1700_v48 = vadd.f32 %v1912_v51, %v1699_v39 }
0x1045   :  { %v1704_v44 = vsel %vm1703_vm10, %v1912_v51, %v1700_v48 }
0x1046   :  { %v1709_v3 = vsel %vm1706_vm11, %v1708_v55, %v1704_v44 }
0x1047   :  { %1712 = vst.msk [vmem:[%s2665_s3] sm:$0x3] %vm1711_vm0, %v1709_v3 }
0x1048   :  { %1717 = vsyncpa [#allocation4], 1 }
0x1049   :  { %1718 = vsyncpa [#allocation6], 1 }
0x104a   :  { %1719 = vsyncpa [#allocation9], 1 }

</bundles_post_ra>
